<compile_context>
chip_gen: v5e
topology: v5e:2x2
jax: 0.10.0
libtpu: 0.0.40
codegen_flags: <defaults>
</compile_context>

<pallas_src>
import jax
import jax.numpy as jnp
from jax.experimental import pallas as pl
from jax.experimental.pallas import tpu as pltpu


def make_kernel(T, C, H, F):
    hd = C // H
    scale = 1.0 / float(hd) ** 0.5
    eps = 1e-5
    f32 = jnp.float32

    def shift1(a):
        # left zero pad + shift by one along the time (lane) axis:
        # out[:, 0] = 0, out[:, t] = a[:, t-1].  (No dense shift matrix / MXU work.)
        z = jnp.zeros((a.shape[0], 1), a.dtype)
        return jnp.concatenate([z, a[:, :-1]], axis=1)

    def layer_norm(r, g, b):
        mu = jnp.mean(r, axis=-1, keepdims=True)
        d = r - mu
        v = jnp.mean(d * d, axis=-1, keepdims=True)
        return d * jax.lax.rsqrt(v + eps) * g + b

    def kernel(x_ref, w1k0_ref, w1k1_ref, b1_ref, w2_ref, b2_ref,
               wqkv_ref, bqkv_ref, wo_ref, bo_ref,
               g1_ref, be1_ref, wf1_ref, bf1_ref, wf2_ref, bf2_ref,
               g2_ref, be2_ref, wl_ref, bl_ref, out_ref):
        xrow = x_ref[0]                                          # (1, T), one sample

        # ---------------- CNN_Block (channels on sublanes, time on lanes) ----------------
        # InstanceNorm1d(1): per-sample stats over time (lane reduction, no A matrix).
        mu = jnp.mean(xrow, axis=-1, keepdims=True)
        cen = xrow - mu
        var = jnp.mean(cen * cen, axis=-1, keepdims=True)
        xn = cen * jax.lax.rsqrt(var + eps)                      # (1, T)

        # left zero pad + Conv1d(1 -> C, k=2): two broadcast taps on the VPU.
        xs = shift1(xn)
        h1 = w1k0_ref[...] * xs + w1k1_ref[...] * xn + b1_ref[...]   # (C, T)
        h1 = jnp.maximum(h1, 0.0)

        # InstanceNorm1d(C): per-channel stats over time (lane reduction).
        m2 = jnp.mean(h1, axis=-1, keepdims=True)
        c2 = h1 - m2
        v2 = jnp.mean(c2 * c2, axis=-1, keepdims=True)
        hn = c2 * jax.lax.rsqrt(v2 + eps)                        # (C, T)

        # left zero pad + Conv1d(C -> C, k=2): both taps fused into ONE matmul.
        hs = shift1(hn)
        stacked = jnp.concatenate([hs, hn], axis=0)              # (2C, T), 8-aligned concat
        h2 = jnp.dot(w2_ref[...], stacked, preferred_element_type=f32) + b2_ref[...]
        h2 = jnp.maximum(h2, 0.0)

        # residual: out + x.repeat(1, C, 1) (x is the normalized input)
        y = h2 + xn                                              # (C, T)

        # ------------- TransformerEncoderLayer (post-norm, relu, eval mode) -------------
        src = y.T                                                # (T, C)

        # fused QKV projection: one (T,C) x (C,3C) dot.
        qkv = jnp.dot(src, wqkv_ref[...], preferred_element_type=f32) + bqkv_ref[...]

        # per-head attention via static lane slices; out_proj folded into the accumulation.
        attn = None
        for h in range(H):
            lo = h * hd
            qh = qkv[:, lo:lo + hd]                              # (T, hd)
            kh = qkv[:, C + lo:C + lo + hd]                      # (T, hd)
            vh = qkv[:, 2 * C + lo:2 * C + lo + hd]              # (T, hd)
            s = jax.lax.dot_general(qh, kh, (((1,), (1,)), ((), ())),
                                    preferred_element_type=f32) * scale   # (T, T)
            s = s - jnp.max(s, axis=-1, keepdims=True)
            e = jnp.exp(s)
            p = e * pl.reciprocal(jnp.sum(e, axis=-1, keepdims=True), approx=True)
            piece = jnp.dot(p, vh, preferred_element_type=f32)   # (T, hd)
            contrib = jnp.dot(piece, wo_ref[lo:lo + hd, :],
                              preferred_element_type=f32)        # (T, C)
            attn = contrib if attn is None else attn + contrib
        attn = attn + bo_ref[...]

        # add & LayerNorm 1
        r = layer_norm(src + attn, g1_ref[...], be1_ref[...])

        # feed-forward (relu)
        ff = jnp.dot(r, wf1_ref[...], preferred_element_type=f32) + bf1_ref[...]
        ff = jnp.maximum(ff, 0.0)
        ff = jnp.dot(ff, wf2_ref[...], preferred_element_type=f32) + bf2_ref[...]

        # add & LayerNorm 2
        r2 = layer_norm(r + ff, g2_ref[...], be2_ref[...])       # (T, C)

        # Linear head on the last time step: lane reduce instead of a 1-lane matmul.
        last = r2[T - 1:T, :]                                    # (1, C)
        out = jnp.sum(last * wl_ref[...], axis=-1, keepdims=True) + bl_ref[...]  # (1, 1)
        out_ref[0] = out

    return kernel


def cnn_transformer_forward(x, P, num_heads=4):
    f32 = jnp.float32
    N, T = x.shape
    C = P['conv1_w'].shape[0]
    H = num_heads
    F = P['ff1_w'].shape[0]

    x3 = x.reshape(N, 1, T).astype(f32)

    # Host-side weight packing is O(C^2) only (no O((N*T)^2) matrices are ever built).
    wlist = [
        P['conv1_w'][:, 0, 0:1].astype(f32),                     # w1k0 (C,1)  tap on x[t-1]
        P['conv1_w'][:, 0, 1:2].astype(f32),                     # w1k1 (C,1)  tap on x[t]
        P['conv1_b'][:, None].astype(f32),                       # b1   (C,1)
        jnp.concatenate([P['conv2_w'][:, :, 0],
                         P['conv2_w'][:, :, 1]], axis=1).astype(f32),  # w2cat (C,2C)
        P['conv2_b'][:, None].astype(f32),                       # b2   (C,1)
        P['in_proj_w'].T.astype(f32),                            # wqkvT (C,3C)
        P['in_proj_b'][None, :].astype(f32),                     # bqkv (1,3C)
        P['out_proj_w'].T.astype(f32),                           # woT  (C,C)
        P['out_proj_b'][None, :].astype(f32),                    # bo   (1,C)
        P['ln1_w'][None, :].astype(f32),                         # g1   (1,C)
        P['ln1_b'][None, :].astype(f32),                         # be1  (1,C)
        P['ff1_w'].T.astype(f32),                                # wf1T (C,F)
        P['ff1_b'][None, :].astype(f32),                         # bf1  (1,F)
        P['ff2_w'].T.astype(f32),                                # wf2T (F,C)
        P['ff2_b'][None, :].astype(f32),                         # bf2  (1,C)
        P['ln2_w'][None, :].astype(f32),                         # g2   (1,C)
        P['ln2_b'][None, :].astype(f32),                         # be2  (1,C)
        P['lin_w'].astype(f32),                                  # wl   (1,C)
        P['lin_b'][None, :].astype(f32),                         # bl   (1,1)
    ]

    def const_spec(a):
        nd = a.ndim
        return pl.BlockSpec(a.shape, lambda n, _nd=nd: (0,) * _nd)   # resident weights

    in_specs = ([pl.BlockSpec((1, 1, T), lambda n: (n, 0, 0))]
                + [const_spec(a) for a in wlist])
    out_specs = pl.BlockSpec((1, 1, 1), lambda n: (n, 0, 0))

    kernel = make_kernel(T, C, H, F)
    out = pl.pallas_call(
        kernel,
        out_shape=jax.ShapeDtypeStruct((N, 1, 1), f32),
        grid=(N,),
        in_specs=in_specs,
        out_specs=out_specs,
        compiler_params=pltpu.CompilerParams(
            dimension_semantics=("parallel",)),
    )(x3, *wlist)
    return out.reshape(-1)


def reference_forward(x, P, num_heads=4):
    """Pure-JAX reference matching the PyTorch forward (eval mode)."""
    eps = 1e-5
    N, T = x.shape
    C = P['conv1_w'].shape[0]
    H = num_heads
    hd = C // H

    xin = x.reshape(N, 1, T)
    mu = jnp.mean(xin, axis=-1, keepdims=True)
    va = jnp.mean((xin - mu) ** 2, axis=-1, keepdims=True)
    xn = (xin - mu) / jnp.sqrt(va + eps)

    xp = jnp.pad(xn, ((0, 0), (0, 0), (1, 0)))
    h = (jnp.einsum('ci,nit->nct', P['conv1_w'][:, :, 0], xp[:, :, :-1])
         + jnp.einsum('ci,nit->nct', P['conv1_w'][:, :, 1], xp[:, :, 1:])
         + P['conv1_b'][None, :, None])
    h = jnp.maximum(h, 0.0)
    mu = jnp.mean(h, axis=-1, keepdims=True)
    va = jnp.mean((h - mu) ** 2, axis=-1, keepdims=True)
    h = (h - mu) / jnp.sqrt(va + eps)
    hp = jnp.pad(h, ((0, 0), (0, 0), (1, 0)))
    h = (jnp.einsum('ci,nit->nct', P['conv2_w'][:, :, 0], hp[:, :, :-1])
         + jnp.einsum('ci,nit->nct', P['conv2_w'][:, :, 1], hp[:, :, 1:])
         + P['conv2_b'][None, :, None])
    h = jnp.maximum(h, 0.0)
    y = h + xn

    s = jnp.transpose(y, (2, 0, 1))          # (T, N, C)
    Wq, Wk, Wv = (P['in_proj_w'][i * C:(i + 1) * C] for i in range(3))
    bq, bk, bv = (P['in_proj_b'][i * C:(i + 1) * C] for i in range(3))
    q = (s @ Wq.T + bq).reshape(T, N, H, hd)
    k = (s @ Wk.T + bk).reshape(T, N, H, hd)
    v = (s @ Wv.T + bv).reshape(T, N, H, hd)
    sc = jnp.einsum('tnhd,snhd->nhts', q, k) / jnp.sqrt(float(hd))
    p_ = jax.nn.softmax(sc, axis=-1)
    att = jnp.einsum('nhts,snhd->tnhd', p_, v).reshape(T, N, C)
    att = att @ P['out_proj_w'].T + P['out_proj_b']
    r = s + att
    mu = jnp.mean(r, -1, keepdims=True)
    va = jnp.mean((r - mu) ** 2, -1, keepdims=True)
    r = (r - mu) / jnp.sqrt(va + eps) * P['ln1_w'] + P['ln1_b']
    f = jnp.maximum(r @ P['ff1_w'].T + P['ff1_b'], 0.0) @ P['ff2_w'].T + P['ff2_b']
    r2 = r + f
    mu = jnp.mean(r2, -1, keepdims=True)
    va = jnp.mean((r2 - mu) ** 2, -1, keepdims=True)
    r2 = (r2 - mu) / jnp.sqrt(va + eps) * P['ln2_w'] + P['ln2_b']
    out = r2[-1] @ P['lin_w'].T + P['lin_b']
    return out.reshape(-1)


def init_params(key, C=8, F=16):
    ks = jax.random.split(key, 14)
    nrm = lambda k, shape, s=0.3: jax.random.normal(k, shape, jnp.float32) * s
    return {
        'conv1_w': nrm(ks[0], (C, 1, 2)),
        'conv1_b': nrm(ks[1], (C,), 0.1),
        'conv2_w': nrm(ks[2], (C, C, 2)),
        'conv2_b': nrm(ks[3], (C,), 0.1),
        'in_proj_w': nrm(ks[4], (3 * C, C)),
        'in_proj_b': nrm(ks[5], (3 * C,), 0.1),
        'out_proj_w': nrm(ks[6], (C, C)),
        'out_proj_b': nrm(ks[7], (C,), 0.1),
        'ln1_w': jnp.ones((C,), jnp.float32),
        'ln1_b': jnp.zeros((C,), jnp.float32),
        'ff1_w': nrm(ks[8], (F, C)),
        'ff1_b': nrm(ks[9], (F,), 0.1),
        'ff2_w': nrm(ks[10], (C, F)),
        'ff2_b': nrm(ks[11], (C,), 0.1),
        'ln2_w': jnp.ones((C,), jnp.float32),
        'ln2_b': jnp.zeros((C,), jnp.float32),
        'lin_w': nrm(ks[12], (1, C)),
        'lin_b': nrm(ks[13], (1,), 0.1),
    }


if __name__ == "__main__":
    key = jax.random.PRNGKey(0)
    kx, kp = jax.random.split(key)

    # module config: filter_numbers=[1, 8], attention_heads=4, hidden_units=16, filter_size=2
    N, T = 4, 16                      # batch, lookback
    x = jax.random.normal(kx, (N, T), jnp.float32)
    P = init_params(kp, C=8, F=16)

    out = cnn_transformer_forward(x, P, num_heads=4)
    out = jax.block_until_ready(out)

    ref = reference_forward(x, P, num_heads=4)
    assert out.shape == (N,)
    # tolerance 2e-3: softmax uses the EUP approximate reciprocal (pl.reciprocal approx=True)
    assert jnp.allclose(out, ref, atol=2e-3, rtol=2e-3), (out, ref)
    print("KERNEL_OK")
</pallas_src>

<mosaic_0001>
module attributes {stable_mosaic.version = 11 : i64} {
  func.func @kernel(%arg0: i32, %arg1: memref<1x1x16xf32, #tpu.memory_space<vmem>>, %arg2: memref<8x1xf32, #tpu.memory_space<vmem>>, %arg3: memref<8x1xf32, #tpu.memory_space<vmem>>, %arg4: memref<8x1xf32, #tpu.memory_space<vmem>>, %arg5: memref<8x16xf32, #tpu.memory_space<vmem>>, %arg6: memref<8x1xf32, #tpu.memory_space<vmem>>, %arg7: memref<8x24xf32, #tpu.memory_space<vmem>>, %arg8: memref<1x24xf32, #tpu.memory_space<vmem>>, %arg9: memref<8x8xf32, #tpu.memory_space<vmem>>, %arg10: memref<1x8xf32, #tpu.memory_space<vmem>>, %arg11: memref<1x8xf32, #tpu.memory_space<vmem>>, %arg12: memref<1x8xf32, #tpu.memory_space<vmem>>, %arg13: memref<8x16xf32, #tpu.memory_space<vmem>>, %arg14: memref<1x16xf32, #tpu.memory_space<vmem>>, %arg15: memref<16x8xf32, #tpu.memory_space<vmem>>, %arg16: memref<1x8xf32, #tpu.memory_space<vmem>>, %arg17: memref<1x8xf32, #tpu.memory_space<vmem>>, %arg18: memref<1x8xf32, #tpu.memory_space<vmem>>, %arg19: memref<1x8xf32, #tpu.memory_space<vmem>>, %arg20: memref<1x1xf32, #tpu.memory_space<vmem>>, %arg21: memref<1x1x1xf32, #tpu.memory_space<vmem>>) attributes {dimension_semantics = [#tpu.dimension_semantics<parallel>], iteration_bounds = array<i64: 4>, scalar_prefetch = 0 : i64, scratch_operands = 0 : i64, tpu.core_type = #tpu.core_type<tc>, window_params = [{transform_indices = @transform_0, window_bounds = array<i64: 1, 1, 16>}, {pipeline_mode = #tpu.pipeline_mode<synchronous>, transform_indices = @transform_1, window_bounds = array<i64: 8, 1>}, {pipeline_mode = #tpu.pipeline_mode<synchronous>, transform_indices = @transform_2, window_bounds = array<i64: 8, 1>}, {pipeline_mode = #tpu.pipeline_mode<synchronous>, transform_indices = @transform_3, window_bounds = array<i64: 8, 1>}, {pipeline_mode = #tpu.pipeline_mode<synchronous>, transform_indices = @transform_4, window_bounds = array<i64: 8, 16>}, {pipeline_mode = #tpu.pipeline_mode<synchronous>, transform_indices = @transform_5, window_bounds = array<i64: 8, 1>}, {pipeline_mode = #tpu.pipeline_mode<synchronous>, transform_indices = @transform_6, window_bounds = array<i64: 8, 24>}, {pipeline_mode = #tpu.pipeline_mode<synchronous>, transform_indices = @transform_7, window_bounds = array<i64: 1, 24>}, {pipeline_mode = #tpu.pipeline_mode<synchronous>, transform_indices = @transform_8, window_bounds = array<i64: 8, 8>}, {pipeline_mode = #tpu.pipeline_mode<synchronous>, transform_indices = @transform_9, window_bounds = array<i64: 1, 8>}, {pipeline_mode = #tpu.pipeline_mode<synchronous>, transform_indices = @transform_10, window_bounds = array<i64: 1, 8>}, {pipeline_mode = #tpu.pipeline_mode<synchronous>, transform_indices = @transform_11, window_bounds = array<i64: 1, 8>}, {pipeline_mode = #tpu.pipeline_mode<synchronous>, transform_indices = @transform_12, window_bounds = array<i64: 8, 16>}, {pipeline_mode = #tpu.pipeline_mode<synchronous>, transform_indices = @transform_13, window_bounds = array<i64: 1, 16>}, {pipeline_mode = #tpu.pipeline_mode<synchronous>, transform_indices = @transform_14, window_bounds = array<i64: 16, 8>}, {pipeline_mode = #tpu.pipeline_mode<synchronous>, transform_indices = @transform_15, window_bounds = array<i64: 1, 8>}, {pipeline_mode = #tpu.pipeline_mode<synchronous>, transform_indices = @transform_16, window_bounds = array<i64: 1, 8>}, {pipeline_mode = #tpu.pipeline_mode<synchronous>, transform_indices = @transform_17, window_bounds = array<i64: 1, 8>}, {pipeline_mode = #tpu.pipeline_mode<synchronous>, transform_indices = @transform_18, window_bounds = array<i64: 1, 8>}, {pipeline_mode = #tpu.pipeline_mode<synchronous>, transform_indices = @transform_19, window_bounds = array<i64: 1, 1>}, {transform_indices = @transform_20, window_bounds = array<i64: 1, 1, 1>}]} {
    %c0 = arith.constant 0 : index
    %c0_0 = arith.constant 0 : index
    %c0_1 = arith.constant 0 : index
    %0 = vector.load %arg1[%c0, %c0_0, %c0_1] : memref<1x1x16xf32, #tpu.memory_space<vmem>>, vector<1x1x16xf32>
    %1 = vector.shape_cast %0 : vector<1x1x16xf32> to vector<1x16xf32>
    %cst = arith.constant dense<0.000000e+00> : vector<1xf32>
    %2 = vector.multi_reduction <add>, %1, %cst [1] : vector<1x16xf32> to vector<1xf32>
    %3 = vector.shape_cast %2 : vector<1xf32> to vector<1x1xf32>
    %cst_2 = arith.constant 1.600000e+01 : f32
    %4 = vector.broadcast %cst_2 : f32 to vector<1x1xf32>
    %5 = arith.divf %3, %4 : vector<1x1xf32>
    %6 = vector.broadcast %5 : vector<1x1xf32> to vector<1x16xf32>
    %7 = arith.subf %1, %6 : vector<1x16xf32>
    %8 = arith.mulf %7, %7 : vector<1x16xf32>
    %cst_3 = arith.constant dense<0.000000e+00> : vector<1xf32>
    %9 = vector.multi_reduction <add>, %8, %cst_3 [1] : vector<1x16xf32> to vector<1xf32>
    %10 = vector.shape_cast %9 : vector<1xf32> to vector<1x1xf32>
    %cst_4 = arith.constant 1.600000e+01 : f32
    %11 = vector.broadcast %cst_4 : f32 to vector<1x1xf32>
    %12 = arith.divf %10, %11 : vector<1x1xf32>
    %cst_5 = arith.constant 9.99999974E-6 : f32
    %13 = vector.broadcast %cst_5 : f32 to vector<1x1xf32>
    %14 = arith.addf %12, %13 : vector<1x1xf32>
    %15 = math.rsqrt %14 : vector<1x1xf32>
    %16 = vector.broadcast %15 : vector<1x1xf32> to vector<1x16xf32>
    %17 = arith.mulf %7, %16 : vector<1x16xf32>
    %cst_6 = arith.constant 0.000000e+00 : f32
    %18 = vector.broadcast %cst_6 : f32 to vector<1x1xf32>
    %19 = vector.extract_strided_slice %17 {offsets = [0, 0], sizes = [1, 15], strides = [1, 1]} : vector<1x16xf32> to vector<1x15xf32>
    %20 = tpu.concatenate %18, %19 in 1 : vector<1x1xf32>, vector<1x15xf32> -> vector<1x16xf32>
    %c0_7 = arith.constant 0 : index
    %c0_8 = arith.constant 0 : index
    %21 = vector.load %arg2[%c0_7, %c0_8] : memref<8x1xf32, #tpu.memory_space<vmem>>, vector<8x1xf32>
    %22 = vector.broadcast %21 : vector<8x1xf32> to vector<8x16xf32>
    %23 = vector.broadcast %20 : vector<1x16xf32> to vector<8x16xf32>
    %24 = arith.mulf %22, %23 : vector<8x16xf32>
    %c0_9 = arith.constant 0 : index
    %c0_10 = arith.constant 0 : index
    %25 = vector.load %arg3[%c0_9, %c0_10] : memref<8x1xf32, #tpu.memory_space<vmem>>, vector<8x1xf32>
    %26 = vector.broadcast %25 : vector<8x1xf32> to vector<8x16xf32>
    %27 = vector.broadcast %17 : vector<1x16xf32> to vector<8x16xf32>
    %28 = arith.mulf %26, %27 : vector<8x16xf32>
    %29 = arith.addf %24, %28 : vector<8x16xf32>
    %c0_11 = arith.constant 0 : index
    %c0_12 = arith.constant 0 : index
    %30 = vector.load %arg4[%c0_11, %c0_12] : memref<8x1xf32, #tpu.memory_space<vmem>>, vector<8x1xf32>
    %31 = vector.broadcast %30 : vector<8x1xf32> to vector<8x16xf32>
    %32 = arith.addf %29, %31 : vector<8x16xf32>
    %cst_13 = arith.constant 0.000000e+00 : f32
    %33 = vector.broadcast %cst_13 : f32 to vector<8x16xf32>
    %34 = arith.maximumf %32, %33 : vector<8x16xf32>
    %cst_14 = arith.constant dense<0.000000e+00> : vector<8xf32>
    %35 = vector.multi_reduction <add>, %34, %cst_14 [1] : vector<8x16xf32> to vector<8xf32>
    %36 = vector.shape_cast %35 : vector<8xf32> to vector<8x1xf32>
    %cst_15 = arith.constant 1.600000e+01 : f32
    %37 = vector.broadcast %cst_15 : f32 to vector<8x1xf32>
    %38 = arith.divf %36, %37 : vector<8x1xf32>
    %39 = vector.broadcast %38 : vector<8x1xf32> to vector<8x16xf32>
    %40 = arith.subf %34, %39 : vector<8x16xf32>
    %41 = arith.mulf %40, %40 : vector<8x16xf32>
    %cst_16 = arith.constant dense<0.000000e+00> : vector<8xf32>
    %42 = vector.multi_reduction <add>, %41, %cst_16 [1] : vector<8x16xf32> to vector<8xf32>
    %43 = vector.shape_cast %42 : vector<8xf32> to vector<8x1xf32>
    %cst_17 = arith.constant 1.600000e+01 : f32
    %44 = vector.broadcast %cst_17 : f32 to vector<8x1xf32>
    %45 = arith.divf %43, %44 : vector<8x1xf32>
    %cst_18 = arith.constant 9.99999974E-6 : f32
    %46 = vector.broadcast %cst_18 : f32 to vector<8x1xf32>
    %47 = arith.addf %45, %46 : vector<8x1xf32>
    %48 = math.rsqrt %47 : vector<8x1xf32>
    %49 = vector.broadcast %48 : vector<8x1xf32> to vector<8x16xf32>
    %50 = arith.mulf %40, %49 : vector<8x16xf32>
    %cst_19 = arith.constant 0.000000e+00 : f32
    %51 = vector.broadcast %cst_19 : f32 to vector<8x1xf32>
    %52 = vector.extract_strided_slice %50 {offsets = [0, 0], sizes = [8, 15], strides = [1, 1]} : vector<8x16xf32> to vector<8x15xf32>
    %53 = tpu.concatenate %51, %52 in 1 : vector<8x1xf32>, vector<8x15xf32> -> vector<8x16xf32>
    %54 = tpu.concatenate %53, %50 in 0 : vector<8x16xf32>, vector<8x16xf32> -> vector<16x16xf32>
    %c0_20 = arith.constant 0 : index
    %c0_21 = arith.constant 0 : index
    %55 = vector.load %arg5[%c0_20, %c0_21] : memref<8x16xf32, #tpu.memory_space<vmem>>, vector<8x16xf32>
    %cst_22 = arith.constant dense<0.000000e+00> : vector<8x16xf32>
    %56 = tpu.matmul %55, %54, %cst_22 {dimension_numbers = #tpu.dot_dimension_numbers<[1], [0], [0], [1], [0, 0, 1, 1], [], []>} : vector<8x16xf32>, vector<16x16xf32>, vector<8x16xf32> -> vector<8x16xf32>
    %c0_23 = arith.constant 0 : index
    %c0_24 = arith.constant 0 : index
    %57 = vector.load %arg6[%c0_23, %c0_24] : memref<8x1xf32, #tpu.memory_space<vmem>>, vector<8x1xf32>
    %58 = vector.broadcast %57 : vector<8x1xf32> to vector<8x16xf32>
    %59 = arith.addf %56, %58 : vector<8x16xf32>
    %cst_25 = arith.constant 0.000000e+00 : f32
    %60 = vector.broadcast %cst_25 : f32 to vector<8x16xf32>
    %61 = arith.maximumf %59, %60 : vector<8x16xf32>
    %62 = vector.broadcast %17 : vector<1x16xf32> to vector<8x16xf32>
    %63 = arith.addf %61, %62 : vector<8x16xf32>
    %64 = tpu.transpose %63, [1, 0] : vector<8x16xf32> -> vector<16x8xf32>
    %c0_26 = arith.constant 0 : index
    %c0_27 = arith.constant 0 : index
    %65 = vector.load %arg7[%c0_26, %c0_27] : memref<8x24xf32, #tpu.memory_space<vmem>>, vector<8x24xf32>
    %cst_28 = arith.constant dense<0.000000e+00> : vector<16x24xf32>
    %66 = tpu.matmul %64, %65, %cst_28 {dimension_numbers = #tpu.dot_dimension_numbers<[1], [0], [0], [1], [0, 0, 1, 1], [], []>} : vector<16x8xf32>, vector<8x24xf32>, vector<16x24xf32> -> vector<16x24xf32>
    %c0_29 = arith.constant 0 : index
    %c0_30 = arith.constant 0 : index
    %67 = vector.load %arg8[%c0_29, %c0_30] : memref<1x24xf32, #tpu.memory_space<vmem>>, vector<1x24xf32>
    %68 = vector.broadcast %67 : vector<1x24xf32> to vector<16x24xf32>
    %69 = arith.addf %66, %68 : vector<16x24xf32>
    %70 = vector.extract_strided_slice %69 {offsets = [0, 0], sizes = [16, 2], strides = [1, 1]} : vector<16x24xf32> to vector<16x2xf32>
    %71 = vector.extract_strided_slice %69 {offsets = [0, 8], sizes = [16, 2], strides = [1, 1]} : vector<16x24xf32> to vector<16x2xf32>
    %72 = vector.extract_strided_slice %69 {offsets = [0, 16], sizes = [16, 2], strides = [1, 1]} : vector<16x24xf32> to vector<16x2xf32>
    %cst_31 = arith.constant dense<0.000000e+00> : vector<16x16xf32>
    %73 = tpu.matmul %70, %71, %cst_31 {dimension_numbers = #tpu.dot_dimension_numbers<[1], [1], [0], [0], [0, 0, 1, 0], [], []>} : vector<16x2xf32>, vector<16x2xf32>, vector<16x16xf32> -> vector<16x16xf32>
    %cst_32 = arith.constant 0.707106769 : f32
    %74 = vector.broadcast %cst_32 : f32 to vector<16x16xf32>
    %75 = arith.mulf %73, %74 : vector<16x16xf32>
    %cst_33 = arith.constant dense<0xFF800000> : vector<16xf32>
    %76 = vector.multi_reduction <maximumf>, %75, %cst_33 [1] : vector<16x16xf32> to vector<16xf32>
    %77 = vector.shape_cast %76 : vector<16xf32> to vector<16x1xf32>
    %78 = vector.broadcast %77 : vector<16x1xf32> to vector<16x16xf32>
    %79 = arith.subf %75, %78 : vector<16x16xf32>
    %80 = math.exp %79 : vector<16x16xf32>
    %cst_34 = arith.constant dense<0.000000e+00> : vector<16xf32>
    %81 = vector.multi_reduction <add>, %80, %cst_34 [1] : vector<16x16xf32> to vector<16xf32>
    %82 = vector.shape_cast %81 : vector<16xf32> to vector<16x1xf32>
    %83 = tpu.reciprocal %82 {approx = true} : vector<16x1xf32> -> vector<16x1xf32>
    %84 = vector.broadcast %83 : vector<16x1xf32> to vector<16x16xf32>
    %85 = arith.mulf %80, %84 : vector<16x16xf32>
    %cst_35 = arith.constant dense<0.000000e+00> : vector<16x2xf32>
    %86 = tpu.matmul %85, %72, %cst_35 {dimension_numbers = #tpu.dot_dimension_numbers<[1], [0], [0], [1], [0, 0, 1, 1], [], []>} : vector<16x16xf32>, vector<16x2xf32>, vector<16x2xf32> -> vector<16x2xf32>
    %c0_36 = arith.constant 0 : index
    %c0_37 = arith.constant 0 : index
    %87 = vector.load %arg9[%c0_36, %c0_37] : memref<8x8xf32, #tpu.memory_space<vmem>>, vector<2x8xf32>
    %cst_38 = arith.constant dense<0.000000e+00> : vector<16x8xf32>
    %88 = tpu.matmul %86, %87, %cst_38 {dimension_numbers = #tpu.dot_dimension_numbers<[1], [0], [0], [1], [0, 0, 1, 1], [], []>} : vector<16x2xf32>, vector<2x8xf32>, vector<16x8xf32> -> vector<16x8xf32>
    %89 = vector.extract_strided_slice %69 {offsets = [0, 2], sizes = [16, 2], strides = [1, 1]} : vector<16x24xf32> to vector<16x2xf32>
    %90 = vector.extract_strided_slice %69 {offsets = [0, 10], sizes = [16, 2], strides = [1, 1]} : vector<16x24xf32> to vector<16x2xf32>
    %91 = vector.extract_strided_slice %69 {offsets = [0, 18], sizes = [16, 2], strides = [1, 1]} : vector<16x24xf32> to vector<16x2xf32>
    %cst_39 = arith.constant dense<0.000000e+00> : vector<16x16xf32>
    %92 = tpu.matmul %89, %90, %cst_39 {dimension_numbers = #tpu.dot_dimension_numbers<[1], [1], [0], [0], [0, 0, 1, 0], [], []>} : vector<16x2xf32>, vector<16x2xf32>, vector<16x16xf32> -> vector<16x16xf32>
    %cst_40 = arith.constant 0.707106769 : f32
    %93 = vector.broadcast %cst_40 : f32 to vector<16x16xf32>
    %94 = arith.mulf %92, %93 : vector<16x16xf32>
    %cst_41 = arith.constant dense<0xFF800000> : vector<16xf32>
    %95 = vector.multi_reduction <maximumf>, %94, %cst_41 [1] : vector<16x16xf32> to vector<16xf32>
    %96 = vector.shape_cast %95 : vector<16xf32> to vector<16x1xf32>
    %97 = vector.broadcast %96 : vector<16x1xf32> to vector<16x16xf32>
    %98 = arith.subf %94, %97 : vector<16x16xf32>
    %99 = math.exp %98 : vector<16x16xf32>
    %cst_42 = arith.constant dense<0.000000e+00> : vector<16xf32>
    %100 = vector.multi_reduction <add>, %99, %cst_42 [1] : vector<16x16xf32> to vector<16xf32>
    %101 = vector.shape_cast %100 : vector<16xf32> to vector<16x1xf32>
    %102 = tpu.reciprocal %101 {approx = true} : vector<16x1xf32> -> vector<16x1xf32>
    %103 = vector.broadcast %102 : vector<16x1xf32> to vector<16x16xf32>
    %104 = arith.mulf %99, %103 : vector<16x16xf32>
    %cst_43 = arith.constant dense<0.000000e+00> : vector<16x2xf32>
    %105 = tpu.matmul %104, %91, %cst_43 {dimension_numbers = #tpu.dot_dimension_numbers<[1], [0], [0], [1], [0, 0, 1, 1], [], []>} : vector<16x16xf32>, vector<16x2xf32>, vector<16x2xf32> -> vector<16x2xf32>
    %c2 = arith.constant 2 : index
    %c0_44 = arith.constant 0 : index
    %106 = vector.load %arg9[%c2, %c0_44] : memref<8x8xf32, #tpu.memory_space<vmem>>, vector<2x8xf32>
    %cst_45 = arith.constant dense<0.000000e+00> : vector<16x8xf32>
    %107 = tpu.matmul %105, %106, %cst_45 {dimension_numbers = #tpu.dot_dimension_numbers<[1], [0], [0], [1], [0, 0, 1, 1], [], []>} : vector<16x2xf32>, vector<2x8xf32>, vector<16x8xf32> -> vector<16x8xf32>
    %108 = arith.addf %88, %107 : vector<16x8xf32>
    %109 = vector.extract_strided_slice %69 {offsets = [0, 4], sizes = [16, 2], strides = [1, 1]} : vector<16x24xf32> to vector<16x2xf32>
    %110 = vector.extract_strided_slice %69 {offsets = [0, 12], sizes = [16, 2], strides = [1, 1]} : vector<16x24xf32> to vector<16x2xf32>
    %111 = vector.extract_strided_slice %69 {offsets = [0, 20], sizes = [16, 2], strides = [1, 1]} : vector<16x24xf32> to vector<16x2xf32>
    %cst_46 = arith.constant dense<0.000000e+00> : vector<16x16xf32>
    %112 = tpu.matmul %109, %110, %cst_46 {dimension_numbers = #tpu.dot_dimension_numbers<[1], [1], [0], [0], [0, 0, 1, 0], [], []>} : vector<16x2xf32>, vector<16x2xf32>, vector<16x16xf32> -> vector<16x16xf32>
    %cst_47 = arith.constant 0.707106769 : f32
    %113 = vector.broadcast %cst_47 : f32 to vector<16x16xf32>
    %114 = arith.mulf %112, %113 : vector<16x16xf32>
    %cst_48 = arith.constant dense<0xFF800000> : vector<16xf32>
    %115 = vector.multi_reduction <maximumf>, %114, %cst_48 [1] : vector<16x16xf32> to vector<16xf32>
    %116 = vector.shape_cast %115 : vector<16xf32> to vector<16x1xf32>
    %117 = vector.broadcast %116 : vector<16x1xf32> to vector<16x16xf32>
    %118 = arith.subf %114, %117 : vector<16x16xf32>
    %119 = math.exp %118 : vector<16x16xf32>
    %cst_49 = arith.constant dense<0.000000e+00> : vector<16xf32>
    %120 = vector.multi_reduction <add>, %119, %cst_49 [1] : vector<16x16xf32> to vector<16xf32>
    %121 = vector.shape_cast %120 : vector<16xf32> to vector<16x1xf32>
    %122 = tpu.reciprocal %121 {approx = true} : vector<16x1xf32> -> vector<16x1xf32>
    %123 = vector.broadcast %122 : vector<16x1xf32> to vector<16x16xf32>
    %124 = arith.mulf %119, %123 : vector<16x16xf32>
    %cst_50 = arith.constant dense<0.000000e+00> : vector<16x2xf32>
    %125 = tpu.matmul %124, %111, %cst_50 {dimension_numbers = #tpu.dot_dimension_numbers<[1], [0], [0], [1], [0, 0, 1, 1], [], []>} : vector<16x16xf32>, vector<16x2xf32>, vector<16x2xf32> -> vector<16x2xf32>
    %c4 = arith.constant 4 : index
    %c0_51 = arith.constant 0 : index
    %126 = vector.load %arg9[%c4, %c0_51] : memref<8x8xf32, #tpu.memory_space<vmem>>, vector<2x8xf32>
    %cst_52 = arith.constant dense<0.000000e+00> : vector<16x8xf32>
    %127 = tpu.matmul %125, %126, %cst_52 {dimension_numbers = #tpu.dot_dimension_numbers<[1], [0], [0], [1], [0, 0, 1, 1], [], []>} : vector<16x2xf32>, vector<2x8xf32>, vector<16x8xf32> -> vector<16x8xf32>
    %128 = arith.addf %108, %127 : vector<16x8xf32>
    %129 = vector.extract_strided_slice %69 {offsets = [0, 6], sizes = [16, 2], strides = [1, 1]} : vector<16x24xf32> to vector<16x2xf32>
    %130 = vector.extract_strided_slice %69 {offsets = [0, 14], sizes = [16, 2], strides = [1, 1]} : vector<16x24xf32> to vector<16x2xf32>
    %131 = vector.extract_strided_slice %69 {offsets = [0, 22], sizes = [16, 2], strides = [1, 1]} : vector<16x24xf32> to vector<16x2xf32>
    %cst_53 = arith.constant dense<0.000000e+00> : vector<16x16xf32>
    %132 = tpu.matmul %129, %130, %cst_53 {dimension_numbers = #tpu.dot_dimension_numbers<[1], [1], [0], [0], [0, 0, 1, 0], [], []>} : vector<16x2xf32>, vector<16x2xf32>, vector<16x16xf32> -> vector<16x16xf32>
    %cst_54 = arith.constant 0.707106769 : f32
    %133 = vector.broadcast %cst_54 : f32 to vector<16x16xf32>
    %134 = arith.mulf %132, %133 : vector<16x16xf32>
    %cst_55 = arith.constant dense<0xFF800000> : vector<16xf32>
    %135 = vector.multi_reduction <maximumf>, %134, %cst_55 [1] : vector<16x16xf32> to vector<16xf32>
    %136 = vector.shape_cast %135 : vector<16xf32> to vector<16x1xf32>
    %137 = vector.broadcast %136 : vector<16x1xf32> to vector<16x16xf32>
    %138 = arith.subf %134, %137 : vector<16x16xf32>
    %139 = math.exp %138 : vector<16x16xf32>
    %cst_56 = arith.constant dense<0.000000e+00> : vector<16xf32>
    %140 = vector.multi_reduction <add>, %139, %cst_56 [1] : vector<16x16xf32> to vector<16xf32>
    %141 = vector.shape_cast %140 : vector<16xf32> to vector<16x1xf32>
    %142 = tpu.reciprocal %141 {approx = true} : vector<16x1xf32> -> vector<16x1xf32>
    %143 = vector.broadcast %142 : vector<16x1xf32> to vector<16x16xf32>
    %144 = arith.mulf %139, %143 : vector<16x16xf32>
    %cst_57 = arith.constant dense<0.000000e+00> : vector<16x2xf32>
    %145 = tpu.matmul %144, %131, %cst_57 {dimension_numbers = #tpu.dot_dimension_numbers<[1], [0], [0], [1], [0, 0, 1, 1], [], []>} : vector<16x16xf32>, vector<16x2xf32>, vector<16x2xf32> -> vector<16x2xf32>
    %c6 = arith.constant 6 : index
    %c0_58 = arith.constant 0 : index
    %146 = vector.load %arg9[%c6, %c0_58] : memref<8x8xf32, #tpu.memory_space<vmem>>, vector<2x8xf32>
    %cst_59 = arith.constant dense<0.000000e+00> : vector<16x8xf32>
    %147 = tpu.matmul %145, %146, %cst_59 {dimension_numbers = #tpu.dot_dimension_numbers<[1], [0], [0], [1], [0, 0, 1, 1], [], []>} : vector<16x2xf32>, vector<2x8xf32>, vector<16x8xf32> -> vector<16x8xf32>
    %148 = arith.addf %128, %147 : vector<16x8xf32>
    %c0_60 = arith.constant 0 : index
    %c0_61 = arith.constant 0 : index
    %149 = vector.load %arg10[%c0_60, %c0_61] : memref<1x8xf32, #tpu.memory_space<vmem>>, vector<1x8xf32>
    %150 = vector.broadcast %149 : vector<1x8xf32> to vector<16x8xf32>
    %151 = arith.addf %148, %150 : vector<16x8xf32>
    %152 = arith.addf %64, %151 : vector<16x8xf32>
    %c0_62 = arith.constant 0 : index
    %c0_63 = arith.constant 0 : index
    %153 = vector.load %arg11[%c0_62, %c0_63] : memref<1x8xf32, #tpu.memory_space<vmem>>, vector<1x8xf32>
    %c0_64 = arith.constant 0 : index
    %c0_65 = arith.constant 0 : index
    %154 = vector.load %arg12[%c0_64, %c0_65] : memref<1x8xf32, #tpu.memory_space<vmem>>, vector<1x8xf32>
    %cst_66 = arith.constant dense<0.000000e+00> : vector<16xf32>
    %155 = vector.multi_reduction <add>, %152, %cst_66 [1] : vector<16x8xf32> to vector<16xf32>
    %156 = vector.shape_cast %155 : vector<16xf32> to vector<16x1xf32>
    %cst_67 = arith.constant 8.000000e+00 : f32
    %157 = vector.broadcast %cst_67 : f32 to vector<16x1xf32>
    %158 = arith.divf %156, %157 : vector<16x1xf32>
    %159 = vector.broadcast %158 : vector<16x1xf32> to vector<16x8xf32>
    %160 = arith.subf %152, %159 : vector<16x8xf32>
    %161 = arith.mulf %160, %160 : vector<16x8xf32>
    %cst_68 = arith.constant dense<0.000000e+00> : vector<16xf32>
    %162 = vector.multi_reduction <add>, %161, %cst_68 [1] : vector<16x8xf32> to vector<16xf32>
    %163 = vector.shape_cast %162 : vector<16xf32> to vector<16x1xf32>
    %cst_69 = arith.constant 8.000000e+00 : f32
    %164 = vector.broadcast %cst_69 : f32 to vector<16x1xf32>
    %165 = arith.divf %163, %164 : vector<16x1xf32>
    %cst_70 = arith.constant 9.99999974E-6 : f32
    %166 = vector.broadcast %cst_70 : f32 to vector<16x1xf32>
    %167 = arith.addf %165, %166 : vector<16x1xf32>
    %168 = math.rsqrt %167 : vector<16x1xf32>
    %169 = vector.broadcast %168 : vector<16x1xf32> to vector<16x8xf32>
    %170 = arith.mulf %160, %169 : vector<16x8xf32>
    %171 = vector.broadcast %153 : vector<1x8xf32> to vector<16x8xf32>
    %172 = arith.mulf %170, %171 : vector<16x8xf32>
    %173 = vector.broadcast %154 : vector<1x8xf32> to vector<16x8xf32>
    %174 = arith.addf %172, %173 : vector<16x8xf32>
    %c0_71 = arith.constant 0 : index
    %c0_72 = arith.constant 0 : index
    %175 = vector.load %arg13[%c0_71, %c0_72] : memref<8x16xf32, #tpu.memory_space<vmem>>, vector<8x16xf32>
    %cst_73 = arith.constant dense<0.000000e+00> : vector<16x16xf32>
    %176 = tpu.matmul %174, %175, %cst_73 {dimension_numbers = #tpu.dot_dimension_numbers<[1], [0], [0], [1], [0, 0, 1, 1], [], []>} : vector<16x8xf32>, vector<8x16xf32>, vector<16x16xf32> -> vector<16x16xf32>
    %c0_74 = arith.constant 0 : index
    %c0_75 = arith.constant 0 : index
    %177 = vector.load %arg14[%c0_74, %c0_75] : memref<1x16xf32, #tpu.memory_space<vmem>>, vector<1x16xf32>
    %178 = vector.broadcast %177 : vector<1x16xf32> to vector<16x16xf32>
    %179 = arith.addf %176, %178 : vector<16x16xf32>
    %cst_76 = arith.constant 0.000000e+00 : f32
    %180 = vector.broadcast %cst_76 : f32 to vector<16x16xf32>
    %181 = arith.maximumf %179, %180 : vector<16x16xf32>
    %c0_77 = arith.constant 0 : index
    %c0_78 = arith.constant 0 : index
    %182 = vector.load %arg15[%c0_77, %c0_78] : memref<16x8xf32, #tpu.memory_space<vmem>>, vector<16x8xf32>
    %cst_79 = arith.constant dense<0.000000e+00> : vector<16x8xf32>
    %183 = tpu.matmul %181, %182, %cst_79 {dimension_numbers = #tpu.dot_dimension_numbers<[1], [0], [0], [1], [0, 0, 1, 1], [], []>} : vector<16x16xf32>, vector<16x8xf32>, vector<16x8xf32> -> vector<16x8xf32>
    %c0_80 = arith.constant 0 : index
    %c0_81 = arith.constant 0 : index
    %184 = vector.load %arg16[%c0_80, %c0_81] : memref<1x8xf32, #tpu.memory_space<vmem>>, vector<1x8xf32>
    %185 = vector.broadcast %184 : vector<1x8xf32> to vector<16x8xf32>
    %186 = arith.addf %183, %185 : vector<16x8xf32>
    %187 = arith.addf %174, %186 : vector<16x8xf32>
    %c0_82 = arith.constant 0 : index
    %c0_83 = arith.constant 0 : index
    %188 = vector.load %arg17[%c0_82, %c0_83] : memref<1x8xf32, #tpu.memory_space<vmem>>, vector<1x8xf32>
    %c0_84 = arith.constant 0 : index
    %c0_85 = arith.constant 0 : index
    %189 = vector.load %arg18[%c0_84, %c0_85] : memref<1x8xf32, #tpu.memory_space<vmem>>, vector<1x8xf32>
    %cst_86 = arith.constant dense<0.000000e+00> : vector<16xf32>
    %190 = vector.multi_reduction <add>, %187, %cst_86 [1] : vector<16x8xf32> to vector<16xf32>
    %191 = vector.shape_cast %190 : vector<16xf32> to vector<16x1xf32>
    %cst_87 = arith.constant 8.000000e+00 : f32
    %192 = vector.broadcast %cst_87 : f32 to vector<16x1xf32>
    %193 = arith.divf %191, %192 : vector<16x1xf32>
    %194 = vector.broadcast %193 : vector<16x1xf32> to vector<16x8xf32>
    %195 = arith.subf %187, %194 : vector<16x8xf32>
    %196 = arith.mulf %195, %195 : vector<16x8xf32>
    %cst_88 = arith.constant dense<0.000000e+00> : vector<16xf32>
    %197 = vector.multi_reduction <add>, %196, %cst_88 [1] : vector<16x8xf32> to vector<16xf32>
    %198 = vector.shape_cast %197 : vector<16xf32> to vector<16x1xf32>
    %cst_89 = arith.constant 8.000000e+00 : f32
    %199 = vector.broadcast %cst_89 : f32 to vector<16x1xf32>
    %200 = arith.divf %198, %199 : vector<16x1xf32>
    %cst_90 = arith.constant 9.99999974E-6 : f32
    %201 = vector.broadcast %cst_90 : f32 to vector<16x1xf32>
    %202 = arith.addf %200, %201 : vector<16x1xf32>
    %203 = math.rsqrt %202 : vector<16x1xf32>
    %204 = vector.broadcast %203 : vector<16x1xf32> to vector<16x8xf32>
    %205 = arith.mulf %195, %204 : vector<16x8xf32>
    %206 = vector.broadcast %188 : vector<1x8xf32> to vector<16x8xf32>
    %207 = arith.mulf %205, %206 : vector<16x8xf32>
    %208 = vector.broadcast %189 : vector<1x8xf32> to vector<16x8xf32>
    %209 = arith.addf %207, %208 : vector<16x8xf32>
    %210 = vector.extract_strided_slice %209 {offsets = [15, 0], sizes = [1, 8], strides = [1, 1]} : vector<16x8xf32> to vector<1x8xf32>
    %c0_91 = arith.constant 0 : index
    %c0_92 = arith.constant 0 : index
    %211 = vector.load %arg19[%c0_91, %c0_92] : memref<1x8xf32, #tpu.memory_space<vmem>>, vector<1x8xf32>
    %212 = arith.mulf %210, %211 : vector<1x8xf32>
    %cst_93 = arith.constant dense<0.000000e+00> : vector<1xf32>
    %213 = vector.multi_reduction <add>, %212, %cst_93 [1] : vector<1x8xf32> to vector<1xf32>
    %214 = vector.shape_cast %213 : vector<1xf32> to vector<1x1xf32>
    %c0_94 = arith.constant 0 : index
    %c0_95 = arith.constant 0 : index
    %215 = vector.load %arg20[%c0_94, %c0_95] : memref<1x1xf32, #tpu.memory_space<vmem>>, vector<1x1xf32>
    %216 = arith.addf %214, %215 : vector<1x1xf32>
    %c0_96 = arith.constant 0 : index
    %c0_97 = arith.constant 0 : index
    %c0_98 = arith.constant 0 : index
    %217 = vector.load %arg21[%c0_96, %c0_97, %c0_98] : memref<1x1x1xf32, #tpu.memory_space<vmem>>, vector<1x1x1xf32>
    %218 = vector.shape_cast %217 : vector<1x1x1xf32> to vector<1x1xf32>
    %219 = vector.shape_cast %216 : vector<1x1xf32> to vector<1x1x1xf32>
    tpu.vector_store %arg21[%c0_96, %c0_97, %c0_98], %219 {strides = array<i32>} : memref<1x1x1xf32, #tpu.memory_space<vmem>>, vector<1x1x1xf32>,
    return
  }
  func.func @transform_0(%arg0: i32) -> (i32, i32, i32) {
    %c0_i32 = arith.constant 0 : i32
    %c0_i32_0 = arith.constant 0 : i32
    %c0_i32_1 = arith.constant 0 : i32
    return %arg0, %c0_i32, %c0_i32_0 : i32, i32, i32
  }
  func.func @transform_1(%arg0: i32) -> (i32, i32) {
    %c0_i32 = arith.constant 0 : i32
    %c0_i32_0 = arith.constant 0 : i32
    %c0_i32_1 = arith.constant 0 : i32
    return %c0_i32, %c0_i32_0 : i32, i32
  }
  func.func @transform_2(%arg0: i32) -> (i32, i32) {
    %c0_i32 = arith.constant 0 : i32
    %c0_i32_0 = arith.constant 0 : i32
    %c0_i32_1 = arith.constant 0 : i32
    return %c0_i32, %c0_i32_0 : i32, i32
  }
  func.func @transform_3(%arg0: i32) -> (i32, i32) {
    %c0_i32 = arith.constant 0 : i32
    %c0_i32_0 = arith.constant 0 : i32
    %c0_i32_1 = arith.constant 0 : i32
    return %c0_i32, %c0_i32_0 : i32, i32
  }
  func.func @transform_4(%arg0: i32) -> (i32, i32) {
    %c0_i32 = arith.constant 0 : i32
    %c0_i32_0 = arith.constant 0 : i32
    %c0_i32_1 = arith.constant 0 : i32
    return %c0_i32, %c0_i32_0 : i32, i32
  }
  func.func @transform_5(%arg0: i32) -> (i32, i32) {
    %c0_i32 = arith.constant 0 : i32
    %c0_i32_0 = arith.constant 0 : i32
    %c0_i32_1 = arith.constant 0 : i32
    return %c0_i32, %c0_i32_0 : i32, i32
  }
  func.func @transform_6(%arg0: i32) -> (i32, i32) {
    %c0_i32 = arith.constant 0 : i32
    %c0_i32_0 = arith.constant 0 : i32
    %c0_i32_1 = arith.constant 0 : i32
    return %c0_i32, %c0_i32_0 : i32, i32
  }
  func.func @transform_7(%arg0: i32) -> (i32, i32) {
    %c0_i32 = arith.constant 0 : i32
    %c0_i32_0 = arith.constant 0 : i32
    %c0_i32_1 = arith.constant 0 : i32
    return %c0_i32, %c0_i32_0 : i32, i32
  }
  func.func @transform_8(%arg0: i32) -> (i32, i32) {
    %c0_i32 = arith.constant 0 : i32
    %c0_i32_0 = arith.constant 0 : i32
    %c0_i32_1 = arith.constant 0 : i32
    return %c0_i32, %c0_i32_0 : i32, i32
  }
  func.func @transform_9(%arg0: i32) -> (i32, i32) {
    %c0_i32 = arith.constant 0 : i32
    %c0_i32_0 = arith.constant 0 : i32
    %c0_i32_1 = arith.constant 0 : i32
    return %c0_i32, %c0_i32_0 : i32, i32
  }
  func.func @transform_10(%arg0: i32) -> (i32, i32) {
    %c0_i32 = arith.constant 0 : i32
    %c0_i32_0 = arith.constant 0 : i32
    %c0_i32_1 = arith.constant 0 : i32
    return %c0_i32, %c0_i32_0 : i32, i32
  }
  func.func @transform_11(%arg0: i32) -> (i32, i32) {
    %c0_i32 = arith.constant 0 : i32
    %c0_i32_0 = arith.constant 0 : i32
    %c0_i32_1 = arith.constant 0 : i32
    return %c0_i32, %c0_i32_0 : i32, i32
  }
  func.func @transform_12(%arg0: i32) -> (i32, i32) {
    %c0_i32 = arith.constant 0 : i32
    %c0_i32_0 = arith.constant 0 : i32
    %c0_i32_1 = arith.constant 0 : i32
    return %c0_i32, %c0_i32_0 : i32, i32
  }
  func.func @transform_13(%arg0: i32) -> (i32, i32) {
    %c0_i32 = arith.constant 0 : i32
    %c0_i32_0 = arith.constant 0 : i32
    %c0_i32_1 = arith.constant 0 : i32
    return %c0_i32, %c0_i32_0 : i32, i32
  }
  func.func @transform_14(%arg0: i32) -> (i32, i32) {
    %c0_i32 = arith.constant 0 : i32
    %c0_i32_0 = arith.constant 0 : i32
    %c0_i32_1 = arith.constant 0 : i32
    return %c0_i32, %c0_i32_0 : i32, i32
  }
  func.func @transform_15(%arg0: i32) -> (i32, i32) {
    %c0_i32 = arith.constant 0 : i32
    %c0_i32_0 = arith.constant 0 : i32
    %c0_i32_1 = arith.constant 0 : i32
    return %c0_i32, %c0_i32_0 : i32, i32
  }
  func.func @transform_16(%arg0: i32) -> (i32, i32) {
    %c0_i32 = arith.constant 0 : i32
    %c0_i32_0 = arith.constant 0 : i32
    %c0_i32_1 = arith.constant 0 : i32
    return %c0_i32, %c0_i32_0 : i32, i32
  }
  func.func @transform_17(%arg0: i32) -> (i32, i32) {
    %c0_i32 = arith.constant 0 : i32
    %c0_i32_0 = arith.constant 0 : i32
    %c0_i32_1 = arith.constant 0 : i32
    return %c0_i32, %c0_i32_0 : i32, i32
  }
  func.func @transform_18(%arg0: i32) -> (i32, i32) {
    %c0_i32 = arith.constant 0 : i32
    %c0_i32_0 = arith.constant 0 : i32
    %c0_i32_1 = arith.constant 0 : i32
    return %c0_i32, %c0_i32_0 : i32, i32
  }
  func.func @transform_19(%arg0: i32) -> (i32, i32) {
    %c0_i32 = arith.constant 0 : i32
    %c0_i32_0 = arith.constant 0 : i32
    %c0_i32_1 = arith.constant 0 : i32
    return %c0_i32, %c0_i32_0 : i32, i32
  }
  func.func @transform_20(%arg0: i32) -> (i32, i32, i32) {
    %c0_i32 = arith.constant 0 : i32
    %c0_i32_0 = arith.constant 0 : i32
    %c0_i32_1 = arith.constant 0 : i32
    return %arg0, %c0_i32, %c0_i32_0 : i32, i32, i32
  }
}

</mosaic_0001>

<bundles_post_ra>
// kernel: tpu_custom_call.1
= control target key start
LH: loop header
LB: loop body
LE: loop exit
PB: predicated region body
PF: predicated region fallthrough
CT: control target
= control target key end

     0   :  { %s1862_s23 = smov 0   ;;  %s2054_s0 = inlined_call_operand.vmem [shape: f32[4,1,16], index: 0, kind: input, shape index: {}]   ;;  %s2055_s1 = inlined_call_operand.vmem [shape: f32[8,1], index: 1, kind: input, shape index: {}]   ;;  %s2056_s2 = inlined_call_operand.vmem [shape: f32[8,1], index: 2, kind: input, shape index: {}]   ;;  %s2057_s3 = inlined_call_operand.vmem [shape: f32[8,1], index: 3, kind: input, shape index: {}]   ;;  %s2058_s4 = inlined_call_operand.vmem [shape: f32[8,16], index: 4, kind: input, shape index: {}]   ;;  %s2059_s5 = inlined_call_operand.vmem [shape: f32[8,1], index: 5, kind: input, shape index: {}]   ;;  %s2060_s6 = inlined_call_operand.vmem [shape: f32[8,24], index: 6, kind: input, shape index: {}]   ;;  %s2061_s7 = inlined_call_operand.vmem [shape: f32[1,24], index: 7, kind: input, shape index: {}]   ;;  %s2062_s8 = inlined_call_operand.vmem [shape: f32[8,8], index: 8, kind: input, shape index: {}]   ;;  %s2063_s9 = inlined_call_operand.vmem [shape: f32[1,8], index: 9, kind: input, shape index: {}]   ;;  %s2064_s10 = inlined_call_operand.vmem [shape: f32[1,8], index: 10, kind: input, shape index: {}]   ;;  %s2065_s11 = inlined_call_operand.vmem [shape: f32[1,8], index: 11, kind: input, shape index: {}]   ;;  %s2066_s12 = inlined_call_operand.vmem [shape: f32[8,16], index: 12, kind: input, shape index: {}]   ;;  %s2067_s13 = inlined_call_operand.vmem [shape: f32[1,16], index: 13, kind: input, shape index: {}]   ;;  %s2068_s14 = inlined_call_operand.vmem [shape: f32[16,8], index: 14, kind: input, shape index: {}]   ;;  %s2069_s15 = inlined_call_operand.vmem [shape: f32[1,8], index: 15, kind: input, shape index: {}]   ;;  %s2070_s16 = inlined_call_operand.vmem [shape: f32[1,8], index: 16, kind: input, shape index: {}]   ;;  %s2071_s17 = inlined_call_operand.vmem [shape: f32[1,8], index: 17, kind: input, shape index: {}]   ;;  %s2072_s18 = inlined_call_operand.vmem [shape: f32[1,8], index: 18, kind: input, shape index: {}]   ;;  %s2073_s19 = inlined_call_operand.<no memory space> [shape: f32[1,1], index: 19, kind: input, shape index: {}]   ;;  %s2074_s20 = inlined_call_operand.vmem [shape: f32[4,1,1], index: 20, kind: output, shape index: {}]  }
   0x1   :  { %2075 = sst [smem:[#allocation3_spill]] %s2054_s0  ;;  %v25_v0 = vstv %s2073_s19 }
   0x2   :  { %2076 = sst [smem:[#allocation4_spill]] %s2055_s1  ;;  %26 = vst [vmem:[#allocation2] sm:$0x1] %v25_v0 }
   0x3   :  { %2077 = sst [smem:[#allocation5_spill]] %s2056_s2 }
   0x4   :  { %2078 = sst [smem:[#allocation6_spill]] %s2057_s3 }
   0x5   :  { %2079 = sst [smem:[#allocation7_spill]] %s2058_s4 }
   0x6 LB: > { %s1574_s24 = sadd.s32 4294967295, %s1737_s23   ;;  %p1578_p0 = scmp.ge.s32.totalorder %s1737_s23, 1  ;;  %s1737_s23 = sphi %s1862_s23, %s32_s23  }
   0x7   : > { %p562_p1 = scmp.lt.s32.totalorder %s1737_s23, 5 }
   0x9   : > { %p563_p2 = pnand %p1578_p0, %p562_p1 }
   0xa   : > { %p616_p3 = scmp.lt.s32.totalorder (!%p563_p2), %s1574_s24, 3  ;;  %s2080_s25 = sld [smem:[#allocation3_spill]] (!%p563_p2) }
   0xb   : > { %566 = sbr.rel (%p563_p2) target bundleno = 3445 (0xd75), region = 100  ;;  %s2081_s28 = sld [smem:[#allocation5_spill]] (!%p563_p2) }
   0xc   : > { %s2082_s30 = sld [smem:[#allocation6_spill]] (!%p563_p2)  ;;  %s1741_s0 = smov (!%p563_p2), 1  }
   0xd   : > { %s2083_s22 = sld [smem:[#allocation4_spill]] (!%p563_p2)  ;;  %s1744_s21 = smov (!%p563_p2), 112  }
   0xe   : > { %s2084_s26 = sld [smem:[#allocation7_spill]] (!%p563_p2)  ;;  %s1745_s1 = smov (!%p563_p2), 118  }
   0xf   : > { %s1747_s19 = smov (!%p563_p2), 114   ;;  %s1748_s2 = smov (!%p563_p2), 116  }
  0x10   : > { %s2086_s24 = smov (!%p616_p3, %s1574_s24), 3  ;;  %vm623_vm0 = vcmask 122880   ;;  %v1739_v3 = vmov 16.0   ;;  %v1740_v5 = vmov 0   ;;  %vm658_vm5 = vcmask 7168   ;;  %v714_v59 = vld [vmem:[%s2059_s5] sm:$0xff] }
  0x11   : > { %s618_s3 = scalar_lea.vmem %s2080_s25, %s2086_s24  ;;  %1685 = vrcp.f32 %v1739_v3  ;;  %v668_v4 = vld [vmem:[%s2081_s28] sm:$0xff]  ;;  %1653 = vset.pattern.permute.xlu2 %v1740_v5  ;;  %1652 = vset.pattern.permute.xlu1 %v1740_v5  ;;  %vm685_vm6 = vcmask 130048   ;;  %vm1579_vm10 = vmneg %vm658_vm5  ;;  %vm782_vm11 = vcmask 64512   ;;  %vm818_vm12 = vcmask 15360   ;;  %s1749_s25 = smov 122  }
  0x12   : > { %v622_v1 = vld [vmem:[%s618_s3] sm:$0x1]  ;;  %671 = vperm.xlu2 %1653, %v668_v4   ;;  %1654 = vset.pattern.permute.xlu0 %v1740_v5  ;;  %vm1015_vm13 = vcmask 1041408   ;;  %s1750_s27 = smov 110   ;;  %s1751_s28 = smov 106  }
  0x13   : > { %v624_v2 = vsel %vm623_vm0, %v622_v1, 0.0  ;;  %v677_v20 = vld [vmem:[%s2082_s30] sm:$0xff]  ;;  %s1742_s30 = smov 120   ;;  %s1752_s4 = smov 108  }
  0x14   : > { %625 = vadd.xlane.f32.xlu0 %v624_v2  ;;  %v660_v30 = vld [vmem:[%s2083_s22] sm:$0xff]  ;;  %s1746_s22 = smov 126  }
  0x15   : > { %v713_v60 = vld [vmem:[%s2084_s26] sm:$0xff] }
  0x16   : > { %v777_v62 = vld [vmem:[%s2060_s6] sm:$0xff] }
  0x17   : > { %v1686_v6 = vpop.eup %1685  ;;  %804 = vmatpush.msra.mxu1 %v777_v62 }
  0x18   : > { %v628_v7 = vmul.f32 16.0, %v1686_v6  ;;  %vm632_vm1 = vweird.f32 %v1686_v6 }
  0x1a   : > { %v629_v8 = vsub.f32 1.0, %v628_v7  ;;  %680 = vperm.xlu2 %1653, %v677_v20  }
  0x1c   : > { %v630_v9 = vmul.f32 %v1686_v6, %v629_v8 }
  0x1e   : > { %v631_v10 = vadd.f32 %v1686_v6, %v630_v9 }
  0x20   : > { %v633_v11 = vsel %vm632_vm1, %v1686_v6, %v631_v10  ;;  %v1675_v6 = vld [vmem:[%s2061_s7] ss:$0 sm:$0xff] }
  0x6c   : > { %v672_v32 = vpop.permute.xlu2 %671 }
  0x74   : > { %v681_v39 = vpop.permute.xlu2 %680 }
  0x87   : > { %v626_v12 = vpop.xlane.xlu0 %625 }
  0x88   : > { %v634_v13 = vmul.f32 %v633_v11, %v626_v12 }
  0x8a   : > { %v635_v14 = vsub.f32 %v622_v1, %v634_v13 }
  0x8c   : > { %v636_v15 = vmul.f32 %v635_v14, %v635_v14 }
  0x8e   : > { %v637_v16 = vsel %vm623_vm0, %v636_v15, 0.0 }
  0x8f   : > { %638 = vadd.xlane.f32.xlu0 %v637_v16 }
 0x102   : > { %v639_v17 = vpop.xlane.xlu0 %638 }
 0x103   : > { %v640_v18 = vmul.f32 %v639_v17, %v633_v11 }
 0x105   : > { %v641_v19 = vadd.f32 1e-05, %v640_v18 }
 0x107   : > { %1687 = vrsqrt.f32 %v641_v19  ;;  %vm648_vm3 = vweird.f32 %v641_v19 }
 0x10d   : > { %v1688_v21 = vpop.eup %1687 }
 0x10e   : > { %v643_v22 = vmul.f32 %v1688_v21, %v641_v19  ;;  %vm649_vm2 = vweird.f32 %v1688_v21 }
 0x10f   : > { %vm650_vm4 = vmor %vm648_vm3, %vm649_vm2 }
 0x110   : > { %v644_v23 = vmul.f32 %v1688_v21, %v643_v22 }
 0x112   : > { %v645_v24 = vmul.f32 0.5, %v644_v23 }
 0x114   : > { %v646_v25 = vsub.f32 1.5, %v645_v24 }
 0x116   : > { %v647_v26 = vmul.f32 %v1688_v21, %v646_v25 }
 0x118   : > { %v651_v27 = vsel %vm650_vm4, %v1688_v21, %v647_v26 }
 0x119   : > { %v652_v28 = vmul.f32 %v651_v27, %v635_v14 }
 0x11b   : > { %v654_v29 = vperm.slane %v652_v28, 0 }
 0x11d   : > { %655 = vrot.lane.b32.xlu1 %v654_v29, %s1741_s0  ;;  %v675_v36 = vmul.f32 %v672_v32, %v654_v29 }
 0x125   : > { %663 = vperm.xlu1 %1652, %v660_v30   ;;  %v909_v30 = vld [vmem:[%s2062_s8] sm:$0x3] }
 0x18f   : > { %v656_v31 = vpop.permute.xlu1 %655 }
 0x190   : > { %v659_v33 = vsel %vm658_vm5, 0.0, %v656_v31 }
 0x191   : > { %v666_v34 = vperm.slane %v659_v33, 0 }
 0x197   : > { %v664_v35 = vpop.permute.xlu1 %663 }
 0x198   : > { %v667_v37 = vmul.f32 %v666_v34, %v664_v35 }
 0x19a   : > { %v676_v38 = vadd.f32 %v675_v36, %v667_v37 }
 0x19c   : > { %v683_v40 = vadd.f32 %v681_v39, %v676_v38 }
 0x19e   : > { %v684_v41 = vmax.f32 %v683_v40, 0.0 }
 0x1a0   : > { %v686_v42 = vsel %vm685_vm6, %v684_v41, 0.0 }
 0x1a1   : > { %687 = vadd.xlane.f32.xlu0 %v686_v42 }
 0x1b5   : > { %717 = vperm.xlu0 %1654, %v714_v59  }
 0x214   : > { %v688_v43 = vpop.xlane.xlu0 %687 }
 0x215   : > { %v689_v44 = vmul.f32 %v688_v43, %v633_v11 }
 0x217   : > { %v690_v45 = vsub.f32 %v684_v41, %v689_v44 }
 0x219   : > { %v691_v46 = vmul.f32 %v690_v45, %v690_v45 }
 0x21b   : > { %v692_v47 = vsel %vm685_vm6, %v691_v46, 0.0 }
 0x21c   : > { %693 = vadd.xlane.f32.xlu1 %v692_v47 }
 0x227   : > { %v718_v63 = vpop.permute.xlu0 %717 }
 0x28f   : > { %v694_v48 = vpop.xlane.xlu1 %693 }
 0x290   : > { %v695_v49 = vmul.f32 %v694_v48, %v633_v11 }
 0x292   : > { %v696_v50 = vadd.f32 1e-05, %v695_v49 }
 0x294   : > { %1689 = vrsqrt.f32 %v696_v50  ;;  %vm703_vm8 = vweird.f32 %v696_v50 }
 0x29a   : > { %v1690_v51 = vpop.eup %1689 }
 0x29b   : > { %v698_v52 = vmul.f32 %v1690_v51, %v696_v50  ;;  %vm704_vm7 = vweird.f32 %v1690_v51 }
 0x29c   : > { %vm705_vm9 = vmor %vm703_vm8, %vm704_vm7  ;;  %vm1519_vm8 = vcmask 64519  }
 0x29d   : > { %v699_v53 = vmul.f32 %v1690_v51, %v698_v52 }
 0x29f   : > { %v700_v54 = vmul.f32 0.5, %v699_v53 }
 0x2a1   : > { %v701_v55 = vsub.f32 1.5, %v700_v54 }
 0x2a3   : > { %v702_v56 = vmul.f32 %v1690_v51, %v701_v55 }
 0x2a5   : > { %v706_v57 = vsel %vm705_vm9, %v1690_v51, %v702_v56  ;;  %vm1528_vm9 = vcmask 7175  }
 0x2a6   : > { %v707_v58 = vmul.f32 %v706_v57, %v690_v45 }
 0x2a8   : > { %709 = vrot.lane.b32.xlu2 %v707_v58, %s1741_s0  ;;  %737 = vmatpush.msra.mxu0 %v707_v58  ;;  %s1743_s0 = smov 124  }
 0x302   : > { %v710_v61 = vpop.permute.xlu2 %709 }
 0x303   : > { %1580 = vmatpush.msk.msra.mxu0 %vm1579_vm10, %v710_v61 }
 0x304   : > { %1581 = vmatmul.msk.f32.vlgmr.msra.gmra.mxu0 %vm685_vm6, %v713_v60 }
 0x381   : > { %v740_v0 = vpop.f32.mrf.mxu0 }
 0x382   : > { %v741_v1 = vadd.f32 %v740_v0, %v718_v63 }
 0x384   : > { %v743_v2 = vmax.f32 %v741_v1, 0.0 }
 0x386   : > { %v744_v3 = vadd.f32 %v743_v2, %v654_v29 }
 0x388   : > { %745 = vxpose.xlu2.b32.start.end [1/1] (short) (narrow) %v744_v3, 16 }
 0x421   : > { %v1903_v4 = vpop.trf.xlu2 }
 0x422   : > { %1582 = vmatmul.msk.f32.vlgmr.msra.gmra.mxu1 %vm782_vm11, %v1903_v4 }
 0x429   : > { %v1907_v5 = vpop.trf.xlu2 }
 0x42a   : > { %1583 = vmatmul.msk.f32.gmra.mxu1 %vm782_vm11, %v1907_v5 }
 0x49f   : > { %v806_v7 = vpop.f32.mrf.mxu1 }
 0x4a0   : > { %v807_v8 = vadd.f32 %v1675_v6, %v806_v7 }
 0x4a2   : > { %814 = vrot.lane.b32.xlu2 %v807_v8, %s1742_s30 }
 0x4a7   : > { %v809_v9 = vpop.f32.mrf.mxu1 }
 0x4a8   : > { %v810_v10 = vadd.f32 %v1675_v6, %v809_v9 }
 0x4aa   : > { %1076 = vrot.lane.b32.xlu2 %v810_v10, %s1743_s0  ;;  %816 = vrot.lane.b32.xlu1 %v810_v10, %s1742_s30  ;;  %v1925_v29 = vpack.i.bf16 %v807_v8, %v810_v10 }
 0x4fc   : > { %v815_v12 = vpop.permute.xlu2 %814 }
 0x504   : > { %v1077_v49 = vpop.permute.xlu2 %1076 }
 0x51c   : > { %v817_v11 = vpop.permute.xlu1 %816 }
 0x51d   : > { %1584 = vmatpush.xpose.msk.msrb.mxu0 %vm818_vm12, %v817_v11  ;;  %1626 = vmatpush.xpose.msk.msra.mxu2 %vm818_vm12, %v817_v11 }
 0x521   : > { %1585 = vmatpush.xpose.msk.msrb.mxu0 %vm818_vm12, %v815_v12  ;;  %1627 = vmatpush.xpose.msk.msra.mxu2 %vm818_vm12, %v815_v12 }
 0x524   : > { %1586 = vmatmul.msk.f32.vlgmr.msrb.gmra.mxu0 %vm818_vm12, %v807_v8  ;;  %1587 = vmatmul.msk.f32.vlgmr.msra.gmra.mxu2 %vm818_vm12, %v810_v10 }
 0x525   : > { %1599 = vmatpush.msk.msrb.mxu2 %vm1015_vm13, %v909_v30 }
 0x5a1   : > { %v844_v13 = vpop.f32.mrf.mxu0 }
 0x5a2   : > { %v850_v14 = vmul.f32 0.70710677, %v844_v13 }
 0x5a4   : > { %v852_v15 = vsel %vm685_vm6, %v850_v14, -inf }
 0x5a5   : > { %853 = vmax.xlane.f32.xlu0 %v852_v15 }
 0x5a7   : > { %v847_v16 = vpop.f32.mrf.mxu2 }
 0x5a8   : > { %v851_v17 = vmul.f32 0.70710677, %v847_v16 }
 0x5aa   : > { %v855_v18 = vsel %vm685_vm6, %v851_v17, -inf }
 0x5ab   : > { %856 = vmax.xlane.f32.xlu1 %v855_v18 }
 0x618   : > { %v854_v19 = vpop.xlane.xlu0 %853 }
 0x619   : > { %v858_v20 = vsub.f32 %v850_v14, %v854_v19 }
 0x61b   : > { %v860_v21 = vmul.f32 1.442695, %v858_v20 }
 0x61d   : > { %1691 = vpow2.f32 %v860_v21 }
 0x61e   : > { %v857_v22 = vpop.xlane.xlu1 %856 }
 0x61f   : > { %v859_v23 = vsub.f32 %v851_v17, %v857_v22 }
 0x621   : > { %v862_v24 = vmul.f32 1.442695, %v859_v23 }
 0x623   : > { %v1692_v25 = vpop.eup %1691  ;;  %1693 = vpow2.f32 %v862_v24 }
 0x624   : > { %v864_v26 = vsel %vm685_vm6, %v1692_v25, 0.0 }
 0x625   : > { %865 = vadd.xlane.f32.xlu0 %v864_v26 }
 0x629   : > { %v1694_v27 = vpop.eup %1693 }
 0x62a   : > { %v867_v28 = vsel %vm685_vm6, %v1694_v27, 0.0 }
 0x62b   : > { %868 = vadd.xlane.f32.xlu1 %v867_v28 }
 0x639   : > { %1656 = vrot.lane.b32.xlu0 %v1925_v29, %s1744_s21 }
 0x641   : > { %914 = vrot.lane.b32.xlu0 %v807_v8, %s1745_s1 }
 0x644   : > { %916 = vrot.lane.b32.xlu1 %v810_v10, %s1745_s1 }
 0x649   : > { %910 = vrot.lane.b32.xlu0 %v807_v8, %s1746_s22 }
 0x64c   : > { %1213 = vrot.lane.b32.xlu1 %v810_v10, %s1747_s19 }
 0x651   : > { %912 = vrot.lane.b32.xlu0 %v810_v10, %s1746_s22 }
 0x654   : > { %1211 = vrot.lane.b32.xlu1 %v807_v8, %s1747_s19 }
 0x659   : > { %1080 = vrot.lane.b32.xlu0 %v810_v10, %s1748_s2 }
 0x65c   : > { %1207 = vrot.lane.b32.xlu1 %v807_v8, %s1749_s25 }
 0x661   : > { %1078 = vrot.lane.b32.xlu0 %v807_v8, %s1748_s2 }
 0x669   : > { %1074 = vrot.lane.b32.xlu0 %v807_v8, %s1743_s0  ;;  %s621_s0 = scalar_lea.vmem %s2074_s20, %s2086_s24 }
 0x671   : > { %1209 = vrot.lane.b32.xlu0 %v810_v10, %s1749_s25 }
 0x698   : > { %v866_v31 = vpop.xlane.xlu0 %865 }
 0x699   : > { %1695 = vrcp.f32 %v866_v31 }
 0x69e   : > { %v869_v32 = vpop.xlane.xlu1 %868 }
 0x69f   : > { %v1696_v34 = vpop.eup %1695  ;;  %1697 = vrcp.f32 %v869_v32 }
 0x6a0   : > { %v872_v37 = vmul.f32 %v1696_v34, %v1692_v25 }
 0x6a5   : > { %v1698_v39 = vpop.eup %1697 }
 0x6a6   : > { %v873_v41 = vmul.f32 %v1698_v39, %v1694_v27 }
 0x6ab   : > { %v1657_v33 = vpop.permute.xlu0 %1656 }
 0x6ac   : > { %v1658_v35 = vunpack.i.l.bf16 %v1657_v33  ;;  %v1659_v36 = vunpack.i.h.bf16 %v1657_v33 }
 0x6ae   : > { %900 = vmatpush.msra.mxu3 %v1658_v35 }
 0x6b0   : > { %901 = vmatpush.msra.mxu3 %v1659_v36 }
 0x6b1   : > { %1588 = vmatmul.msk.f32.vlgmr.msra.gmra.mxu3 %vm685_vm6, %v872_v37 }
 0x6b3   : > { %v915_v38 = vpop.permute.xlu0 %914 }
 0x6b6   : > { %v917_v40 = vpop.permute.xlu1 %916 }
 0x6b7   : > { %1590 = vmatpush.xpose.msk.msra.mxu0 %vm818_vm12, %v917_v40 }
 0x6b9   : > { %1589 = vmatmul.msk.f32.gmra.mxu3 %vm685_vm6, %v873_v41 }
 0x6bb   : > { %1591 = vmatpush.xpose.msk.msra.mxu0 %vm818_vm12, %v915_v38  ;;  %v911_v42 = vpop.permute.xlu0 %910 }
 0x6be   : > { %v1214_v43 = vpop.permute.xlu1 %1213  ;;  %1592 = vmatmul.msk.f32.vlgmr.msra.gmra.mxu0 %vm818_vm12, %v911_v42 }
 0x6bf   : > { %1611 = vmatpush.xpose.msk.msra.mxu2 %vm818_vm12, %v1214_v43 }
 0x6c3   : > { %v913_v44 = vpop.permute.xlu0 %912 }
 0x6c6   : > { %v1212_v45 = vpop.permute.xlu1 %1211  ;;  %1593 = vmatmul.msk.f32.gmra.mxu0 %vm818_vm12, %v913_v44 }
 0x6c7   : > { %1612 = vmatpush.xpose.msk.msra.mxu2 %vm818_vm12, %v1212_v45 }
 0x6cb   : > { %v1081_v46 = vpop.permute.xlu0 %1080 }
 0x6cc   : > { %1602 = vmatpush.xpose.msk.msrb.mxu0 %vm818_vm12, %v1081_v46 }
 0x6ce   : > { %v1208_v56 = vpop.permute.xlu1 %1207 }
 0x6d3   : > { %v1079_v47 = vpop.permute.xlu0 %1078 }
 0x6d4   : > { %1603 = vmatpush.xpose.msk.msrb.mxu0 %vm818_vm12, %v1079_v47 }
 0x6db   : > { %v1075_v48 = vpop.permute.xlu0 %1074 }
 0x6dc   : > { %1604 = vmatmul.msk.f32.vlgmr.msrb.gmra.mxu0 %vm818_vm12, %v1075_v48 }
 0x6e3   : > { %v1210_v59 = vpop.permute.xlu0 %1209 }
 0x6e4   : > { %1605 = vmatmul.msk.f32.gmra.mxu0 %vm818_vm12, %v1077_v49 }
 0x734   : > { %v903_v50 = vpop.f32.mrf.mxu3 }
 0x735   : > { %1600 = vmatmul.msk.f32.vlgmr.msrb.gmra.mxu2 %vm818_vm12, %v903_v50 }
 0x73b   : > { %v943_v51 = vpop.f32.mrf.mxu0 }
 0x73c   : > { %v949_v52 = vmul.f32 0.70710677, %v943_v51  ;;  %v906_v53 = vpop.f32.mrf.mxu3 }
 0x73d   : > { %1601 = vmatmul.msk.f32.gmra.mxu2 %vm818_vm12, %v906_v53 }
 0x73e   : > { %v951_v54 = vsel %vm685_vm6, %v949_v52, -inf }
 0x73f   : > { %952 = vmax.xlane.f32.xlu1 %v951_v54 }
 0x743   : > { %v946_v55 = vpop.f32.mrf.mxu0 }
 0x744   : > { %v950_v57 = vmul.f32 0.70710677, %v946_v55 }
 0x745   : > { %1613 = vmatmul.msk.f32.vlgmr.msra.gmra.mxu2 %vm818_vm12, %v1208_v56 }
 0x746   : > { %v954_v58 = vsel %vm685_vm6, %v950_v57, -inf }
 0x747   : > { %955 = vmax.xlane.f32.xlu2 %v954_v58 }
 0x74d   : > { %1614 = vmatmul.msk.f32.gmra.mxu2 %vm818_vm12, %v1210_v59 }
 0x759   : > { %v1107_v60 = vpop.f32.mrf.mxu0 }
 0x75a   : > { %v1113_v61 = vmul.f32 0.70710677, %v1107_v60 }
 0x75c   : > { %v1115_v62 = vsel %vm685_vm6, %v1113_v61, -inf }
 0x75d   : > { %1116 = vmax.xlane.f32.xlu0 %v1115_v62 }
 0x761   : > { %v1110_v63 = vpop.f32.mrf.mxu0 }
 0x762   : > { %v1114_v0 = vmul.f32 0.70710677, %v1110_v63  ;;  %v1008_v63 = vld [vmem:[%s2062_s8 + $0x2] sm:$0x3] }
 0x763   : > { %1596 = vmatpush.msk.msrb.mxu3 %vm1015_vm13, %v1008_v63 }
 0x764   : > { %v1118_v1 = vsel %vm685_vm6, %v1114_v0, -inf }
 0x765   : > { %1119 = vmax.xlane.f32.xlu1 %v1118_v1  ;;  %v1172_v1 = vld [vmem:[%s2062_s8 + $0x4] sm:$0x3] }
 0x766   : > { %1608 = vmatpush.msk.msra.mxu3 %vm1015_vm13, %v1172_v1 }
 0x7b2   : > { %v953_v2 = vpop.xlane.xlu1 %952 }
 0x7b3   : > { %v957_v3 = vsub.f32 %v949_v52, %v953_v2 }
 0x7b5   : > { %v959_v6 = vmul.f32 1.442695, %v957_v3 }
 0x7b7   : > { %1699 = vpow2.f32 %v959_v6 }
 0x7b8   : > { %v1953_v7 = vpop.f32.mrf.mxu2 }
 0x7ba   : > { %v956_v11 = vpop.xlane.xlu2 %955 }
 0x7bb   : > { %v958_v14 = vsub.f32 %v950_v57, %v956_v11  ;;  %v1305_v11 = vld [vmem:[%s2062_s8 + $0x6] sm:$0x3] }
 0x7bd   : > { %v1700_v8 = vpop.eup %1699  ;;  %v961_v16 = vmul.f32 1.442695, %v958_v14 }
 0x7be   : > { %v963_v9 = vsel %vm685_vm6, %v1700_v8, 0.0 }
 0x7bf   : > { %964 = vadd.xlane.f32.xlu1 %v963_v9  ;;  %1701 = vpow2.f32 %v961_v16 }
 0x7c0   : > { %v1956_v10 = vpop.f32.mrf.mxu2 }
 0x7c5   : > { %v1702_v23 = vpop.eup %1701 }
 0x7c6   : > { %v966_v28 = vsel %vm685_vm6, %v1702_v23, 0.0 }
 0x7c8   : > { %v1240_v12 = vpop.f32.mrf.mxu2 }
 0x7c9   : > { %v1246_v13 = vmul.f32 0.70710677, %v1240_v12 }
 0x7cb   : > { %v1248_v15 = vsel %vm685_vm6, %v1246_v13, -inf }
 0x7cc   : > { %1249 = vmax.xlane.f32.xlu2 %v1248_v15 }
 0x7d0   : > { %v1117_v17 = vpop.xlane.xlu0 %1116  ;;  %v1243_v18 = vpop.f32.mrf.mxu2 }
 0x7d1   : > { %v1121_v19 = vsub.f32 %v1113_v61, %v1117_v17  ;;  %v1247_v20 = vmul.f32 0.70710677, %v1243_v18 }
 0x7d3   : > { %v1123_v21 = vmul.f32 1.442695, %v1121_v19  ;;  %v1251_v22 = vsel %vm685_vm6, %v1247_v20, -inf }
 0x7d4   : > { %1252 = vmax.xlane.f32.xlu0 %v1251_v22 }
 0x7d5   : > { %1703 = vpow2.f32 %v1123_v21 }
 0x7d8   : > { %v1120_v24 = vpop.xlane.xlu1 %1119 }
 0x7d9   : > { %v1122_v25 = vsub.f32 %v1114_v0, %v1120_v24 }
 0x7db   : > { %v1704_v26 = vpop.eup %1703  ;;  %v1125_v27 = vmul.f32 1.442695, %v1122_v25 }
 0x7dc   : > { %967 = vadd.xlane.f32.xlu0 %v966_v28  ;;  %v1127_v30 = vsel %vm685_vm6, %v1704_v26, 0.0 }
 0x7dd   : > { %1705 = vpow2.f32 %v1125_v27  ;;  %1128 = vadd.xlane.f32.xlu1 %v1127_v30 }
 0x7e3   : > { %v1706_v31 = vpop.eup %1705 }
 0x7e4   : > { %1661 = vrot.lane.b32.xlu2 %v1925_v29, %s1750_s27  ;;  %v1130_v32 = vsel %vm685_vm6, %v1706_v31, 0.0 }
 0x7e5   : > { %1131 = vadd.xlane.f32.xlu1 %v1130_v32 }
 0x7ec   : > { %1671 = vrot.lane.b32.xlu2 %v1925_v29, %s1751_s28 }
 0x7f0   : > { %1666 = vrot.lane.b32.xlu0 %v1925_v29, %s1752_s4 }
 0x832   : > { %v965_v33 = vpop.xlane.xlu1 %964 }
 0x833   : > { %1707 = vrcp.f32 %v965_v33 }
 0x839   : > { %v1708_v39 = vpop.eup %1707 }
 0x83a   : > { %v971_v46 = vmul.f32 %v1708_v39, %v1700_v8 }
 0x83f   : > { %v1250_v34 = vpop.xlane.xlu2 %1249 }
 0x840   : > { %v1254_v35 = vsub.f32 %v1246_v13, %v1250_v34 }
 0x842   : > { %v1256_v36 = vmul.f32 1.442695, %v1254_v35 }
 0x844   : > { %1709 = vpow2.f32 %v1256_v36 }
 0x847   : > { %v1253_v37 = vpop.xlane.xlu0 %1252  ;;  %v1662_v38 = vpop.permute.xlu2 %1661 }
 0x848   : > { %v1255_v40 = vsub.f32 %v1247_v20, %v1253_v37  ;;  %v1663_v41 = vunpack.i.l.bf16 %v1662_v38  ;;  %v1664_v44 = vunpack.i.h.bf16 %v1662_v38  ;;  %v1753_v37 = vmov 8.0  }
 0x84a   : > { %v1710_v42 = vpop.eup %1709  ;;  %v1258_v43 = vmul.f32 1.442695, %v1255_v40  ;;  %999 = vmatpush.msrb.mxu1 %v1663_v41 }
 0x84b   : > { %v1260_v45 = vsel %vm685_vm6, %v1710_v42, 0.0 }
 0x84c   : > { %1711 = vpow2.f32 %v1258_v43  ;;  %1261 = vadd.xlane.f32.xlu1 %v1260_v45  ;;  %1000 = vmatpush.msrb.mxu1 %v1664_v44 }
 0x84d   : > { %1594 = vmatmul.msk.f32.vlgmr.msrb.gmra.mxu1 %vm685_vm6, %v971_v46 }
 0x84f   : > { %v968_v29 = vpop.xlane.xlu0 %967  ;;  %v1672_v47 = vpop.permute.xlu2 %1671 }
 0x850   : > { %1713 = vrcp.f32 %v968_v29  ;;  %v1673_v48 = vunpack.i.l.bf16 %v1672_v47  ;;  %v1674_v50 = vunpack.i.h.bf16 %v1672_v47  ;;  %v1129_v54 = vpop.xlane.xlu1 %1128 }
 0x851   : > { %1715 = vrcp.f32 %v1129_v54  ;;  %v1448_v54 = vld [vmem:[%s2068_s14 + $0x8] sm:$0xff] }
 0x852   : > { %v1712_v49 = vpop.eup %1711  ;;  %1296 = vmatpush.msra.mxu0 %v1673_v48  ;;  %1473 = vmatpush.msrb.mxu2 %v1448_v54 }
 0x853   : > { %v1263_v51 = vsel %vm685_vm6, %v1712_v49, 0.0 }
 0x854   : > { %1264 = vadd.xlane.f32.xlu1 %v1263_v51  ;;  %1297 = vmatpush.msra.mxu0 %v1674_v50  ;;  %v1411_v50 = vld [vmem:[%s2066_s12] sm:$0xff] }
 0x856   : > { %v1714_v52 = vpop.eup %1713 }
 0x857   : > { %v972_v53 = vmul.f32 %v1714_v52, %v1702_v23  ;;  %v1716_v57 = vpop.eup %1715  ;;  %v1676_v23 = vld [vmem:[%s2063_s9] ss:$0 sm:$0xff] }
 0x858   : > { %v1132_v55 = vpop.xlane.xlu1 %1131  ;;  %v1135_v60 = vmul.f32 %v1716_v57, %v1704_v26 }
 0x859   : > { %1595 = vmatmul.msk.f32.gmra.mxu1 %vm685_vm6, %v972_v53  ;;  %1717 = vrcp.f32 %v1132_v55  ;;  %v1447_v55 = vld [vmem:[%s2068_s14] sm:$0xff] }
 0x85a   : > { %1474 = vmatpush.msrb.mxu2 %v1447_v55 }
 0x85f   : > { %v1718_v61 = vpop.eup %1717 }
 0x860   : > { %v1136_v62 = vmul.f32 %v1718_v61, %v1706_v31 }
 0x862   : > { %v1667_v56 = vpop.permute.xlu0 %1666 }
 0x863   : > { %v1668_v58 = vunpack.i.l.bf16 %v1667_v56  ;;  %v1669_v59 = vunpack.i.h.bf16 %v1667_v56 }
 0x865   : > { %1163 = vmatpush.msra.mxu1 %v1668_v58 }
 0x867   : > { %1164 = vmatpush.msra.mxu1 %v1669_v59 }
 0x868   : > { %1606 = vmatmul.msk.f32.vlgmr.msra.gmra.mxu1 %vm685_vm6, %v1135_v60 }
 0x869   : > { %1617 = vmatpush.msk.msrb.mxu1 %vm1015_vm13, %v1305_v11  ;;  %v1678_v11 = vld [vmem:[%s2065_s11] ss:$0 sm:$0xff] }
 0x870   : > { %1607 = vmatmul.msk.f32.gmra.mxu1 %vm685_vm6, %v1136_v62 }
 0x8bf   : > { %v1262_v0 = vpop.xlane.xlu1 %1261 }
 0x8c0   : > { %1719 = vrcp.f32 %v1262_v0 }
 0x8c6   : > { %v1720_v2 = vpop.eup %1719 }
 0x8c7   : > { %v1268_v3 = vmul.f32 %v1720_v2, %v1710_v42  ;;  %v1265_v6 = vpop.xlane.xlu1 %1264 }
 0x8c8   : > { %1721 = vrcp.f32 %v1265_v6 }
 0x8c9   : > { %1615 = vmatmul.msk.f32.vlgmr.msra.gmra.mxu0 %vm685_vm6, %v1268_v3  ;;  %1723 = vrcp.f32 %v1753_v37  ;;  %v1677_v3 = vld [vmem:[%s2064_s10] ss:$0 sm:$0xff] }
 0x8ca   : > { %v1002_v8 = vpop.f32.mrf.mxu1 }
 0x8cb   : > { %1597 = vmatmul.msk.f32.vlgmr.msrb.gmra.mxu3 %vm818_vm12, %v1002_v8 }
 0x8cc   : > { %1437 = vmatpush.msrb.mxu3 %v1411_v50 }
 0x8ce   : > { %v1722_v9 = vpop.eup %1721 }
 0x8cf   : > { %v1269_v12 = vmul.f32 %v1722_v9, %v1712_v49  ;;  %v1724_v38 = vpop.eup %1723 }
 0x8d0   : > { %v1357_v39 = vmul.f32 8.0, %v1724_v38  ;;  %vm1361_vm14 = vweird.f32 %v1724_v38 }
 0x8d1   : > { %1616 = vmatmul.msk.f32.gmra.mxu0 %vm685_vm6, %v1269_v12 }
 0x8d2   : > { %v1358_v40 = vsub.f32 1.0, %v1357_v39 }
 0x8d6   : > { %v1005_v13 = vpop.f32.mrf.mxu1 }
 0x8d7   : > { %1598 = vmatmul.msk.f32.gmra.mxu3 %vm818_vm12, %v1005_v13 }
 0x8e5   : > { %v1166_v14 = vpop.f32.mrf.mxu1 }
 0x8e6   : > { %1609 = vmatmul.msk.f32.vlgmr.msra.gmra.mxu3 %vm818_vm12, %v1166_v14 }
 0x8ed   : > { %v1169_v15 = vpop.f32.mrf.mxu1 }
 0x8ee   : > { %1610 = vmatmul.msk.f32.gmra.mxu3 %vm818_vm12, %v1169_v15 }
 0x946   : > { %v1299_v16 = vpop.f32.mrf.mxu0 }
 0x947   : > { %1618 = vmatmul.msk.f32.vlgmr.msrb.gmra.mxu1 %vm818_vm12, %v1299_v16 }
 0x94e   : > { %v1302_v17 = vpop.f32.mrf.mxu0  ;;  %v1036_v18 = vpop.f32.mrf.mxu3 }
 0x94f   : > { %1619 = vmatmul.msk.f32.gmra.mxu1 %vm818_vm12, %v1302_v17  ;;  %v1069_v21 = vadd.f32 %v1953_v7, %v1036_v18 }
 0x95a   : > { %v1039_v19 = vpop.f32.mrf.mxu3 }
 0x95b   : > { %v1072_v28 = vadd.f32 %v1956_v10, %v1039_v19  ;;  %v1359_v10 = vmul.f32 %v1724_v38, %v1358_v40 }
 0x95d   : > { %v1360_v41 = vadd.f32 %v1724_v38, %v1359_v10 }
 0x969   : > { %v1199_v20 = vpop.f32.mrf.mxu3 }
 0x96a   : > { %v1205_v22 = vadd.f32 %v1199_v20, %v1069_v21  ;;  %v1679_v21 = vld [vmem:[%s2067_s13] ss:$0 sm:$0xff] }
 0x971   : > { %v1202_v27 = vpop.f32.mrf.mxu3 }
 0x972   : > { %v1206_v31 = vadd.f32 %v1202_v27, %v1072_v28 }
 0x9c4   : > { %v1332_v24 = vpop.f32.mrf.mxu1 }
 0x9c5   : > { %v1338_v25 = vadd.f32 %v1332_v24, %v1205_v22 }
 0x9c7   : > { %v1344_v26 = vadd.f32 %v1676_v23, %v1338_v25 }
 0x9c9   : > { %v1346_v30 = vadd.f32 %v1344_v26, %v1903_v4  ;;  %v2001_v4 = vsel %vm1361_vm14, %v1724_v38, %v1360_v41 }
 0x9cb   : > { %v1350_v32 = vsel %vm782_vm11, %v1346_v30, 0.0 }
 0x9cc   : > { %v1335_v33 = vpop.f32.mrf.mxu1  ;;  %1351 = vadd.xlane.f32.xlu2 %v1350_v32 }
 0x9cd   : > { %v1339_v34 = vadd.f32 %v1335_v33, %v1206_v31 }
 0x9cf   : > { %v1345_v7 = vadd.f32 %v1676_v23, %v1339_v34 }
 0x9d1   : > { %v1347_v35 = vadd.f32 %v1345_v7, %v1907_v5 }
 0x9d3   : > { %v1353_v36 = vsel %vm782_vm11, %v1347_v35, 0.0 }
 0x9d4   : > { %1354 = vadd.xlane.f32.xlu0 %v1353_v36 }
 0xa3f   : > { %v1352_v42 = vpop.xlane.xlu2 %1351 }
 0xa40   : > { %v1363_v43 = vmul.f32 %v2001_v4, %v1352_v42 }
 0xa42   : > { %v1365_v44 = vsub.f32 %v1346_v30, %v1363_v43  ;;  %v1680_v30 = vld [vmem:[%s2069_s15] ss:$0 sm:$0xff] }
 0xa44   : > { %v1367_v45 = vmul.f32 %v1365_v44, %v1365_v44 }
 0xa46   : > { %v1369_v5 = vsel %vm782_vm11, %v1367_v45, 0.0 }
 0xa47   : > { %1370 = vadd.xlane.f32.xlu1 %v1369_v5  ;;  %v1355_v46 = vpop.xlane.xlu0 %1354 }
 0xa48   : > { %v1364_v29 = vmul.f32 %v2001_v4, %v1355_v46  ;;  %v1681_v46 = vld [vmem:[%s2070_s16] ss:$0 sm:$0xff] }
 0xa4a   : > { %v1366_v47 = vsub.f32 %v1347_v35, %v1364_v29 }
 0xa4c   : > { %v1368_v48 = vmul.f32 %v1366_v47, %v1366_v47 }
 0xa4e   : > { %v1372_v49 = vsel %vm782_vm11, %v1368_v48, 0.0 }
 0xa4f   : > { %1373 = vadd.xlane.f32.xlu1 %v1372_v49  ;;  %v1683_v49 = vld [vmem:[%s2072_s18] ss:$0 sm:$0xff] }
 0xaba   : > { %v1371_v51 = vpop.xlane.xlu1 %1370 }
 0xabb   : > { %v1375_v52 = vmul.f32 %v1371_v51, %v2001_v4 }
 0xabd   : > { %v1377_v53 = vadd.f32 1e-05, %v1375_v52 }
 0xabf   : > { %1725 = vrsqrt.f32 %v1377_v53  ;;  %vm1385_vm0 = vweird.f32 %v1377_v53 }
 0xac2   : > { %v1374_v56 = vpop.xlane.xlu1 %1373 }
 0xac3   : > { %v1376_v57 = vmul.f32 %v1374_v56, %v2001_v4 }
 0xac5   : > { %v1726_v58 = vpop.eup %1725  ;;  %v1378_v59 = vadd.f32 1e-05, %v1376_v57 }
 0xac6   : > { %v1380_v60 = vmul.f32 %v1726_v58, %v1377_v53  ;;  %vm1386_vm15 = vweird.f32 %v1726_v58  ;;  %v1684_v53 = vld [vmem:[#allocation2] ss:$0 sm:$0xff] }
 0xac7   : > { %1727 = vrsqrt.f32 %v1378_v59  ;;  %vm1387_vm1 = vmor %vm1385_vm0, %vm1386_vm15  ;;  %vm1395_vm3 = vweird.f32 %v1378_v59 }
 0xac8   : > { %v1381_v61 = vmul.f32 %v1726_v58, %v1380_v60 }
 0xaca   : > { %v1382_v62 = vmul.f32 0.5, %v1381_v61 }
 0xacc   : > { %v1383_v63 = vsub.f32 1.5, %v1382_v62 }
 0xacd   : > { %v1728_v0 = vpop.eup %1727 }
 0xace   : > { %v1384_v1 = vmul.f32 %v1726_v58, %v1383_v63  ;;  %v1390_v2 = vmul.f32 %v1728_v0, %v1378_v59  ;;  %vm1396_vm2 = vweird.f32 %v1728_v0 }
 0xacf   : > { %vm1397_vm4 = vmor %vm1395_vm3, %vm1396_vm2 }
 0xad0   : > { %v1388_v6 = vsel %vm1387_vm1, %v1726_v58, %v1384_v1  ;;  %v1391_v8 = vmul.f32 %v1728_v0, %v1390_v2 }
 0xad1   : > { %v1399_v9 = vmul.f32 %v1388_v6, %v1365_v44 }
 0xad2   : > { %v1392_v12 = vmul.f32 0.5, %v1391_v8 }
 0xad3   : > { %v1404_v13 = vmul.f32 %v1677_v3, %v1399_v9 }
 0xad4   : > { %v1393_v14 = vsub.f32 1.5, %v1392_v12 }
 0xad5   : > { %v1409_v15 = vadd.f32 %v1678_v11, %v1404_v13 }
 0xad6   : > { %v1394_v16 = vmul.f32 %v1728_v0, %v1393_v14 }
 0xad7   : > { %1620 = vmatmul.msk.f32.vlgmr.msrb.gmra.mxu3 %vm782_vm11, %v1409_v15 }
 0xad8   : > { %v1398_v17 = vsel %vm1397_vm4, %v1728_v0, %v1394_v16 }
 0xad9   : > { %v1400_v18 = vmul.f32 %v1398_v17, %v1366_v47 }
 0xadb   : > { %v1405_v19 = vmul.f32 %v1677_v3, %v1400_v18 }
 0xadd   : > { %v1410_v20 = vadd.f32 %v1678_v11, %v1405_v19 }
 0xadf   : > { %1621 = vmatmul.msk.f32.gmra.mxu3 %vm782_vm11, %v1410_v20 }
 0xb5a   : > { %v1439_v22 = vpop.f32.mrf.mxu3 }
 0xb5b   : > { %v1440_v23 = vadd.f32 %v1679_v21, %v1439_v22 }
 0xb5d   : > { %v1445_v24 = vmax.f32 %v1440_v23, 0.0 }
 0xb5f   : > { %1622 = vmatmul.msk.f32.vlgmr.msrb.gmra.mxu2 %vm685_vm6, %v1445_v24 }
 0xb62   : > { %v1442_v25 = vpop.f32.mrf.mxu3 }
 0xb63   : > { %v1443_v26 = vadd.f32 %v1679_v21, %v1442_v25 }
 0xb65   : > { %v1446_v27 = vmax.f32 %v1443_v26, 0.0 }
 0xb67   : > { %1623 = vmatmul.msk.f32.gmra.mxu2 %vm685_vm6, %v1446_v27 }
 0xbe2   : > { %v1476_v28 = vpop.f32.mrf.mxu2 }
 0xbea   : > { %v1478_v31 = vpop.f32.mrf.mxu2 }
 0xbeb   : > { %v1479_v32 = vadd.f32 %v1680_v30, %v1478_v31 }
 0xbed   : > { %v1481_v33 = vadd.f32 %v1479_v32, %v1410_v20 }
 0xbef   : > { %v1484_v34 = vsel %vm782_vm11, %v1481_v33, 0.0 }
 0xbf0   : > { %1485 = vadd.xlane.f32.xlu1 %v1484_v34 }
 0xc63   : > { %v1486_v7 = vpop.xlane.xlu1 %1485 }
 0xc64   : > { %v1487_v35 = vmul.f32 %v1486_v7, %v2001_v4 }
 0xc66   : > { %v1488_v36 = vsub.f32 %v1481_v33, %v1487_v35 }
 0xc68   : > { %v1489_v37 = vmul.f32 %v1488_v36, %v1488_v36 }
 0xc6a   : > { %v1490_v38 = vsel %vm782_vm11, %v1489_v37, 0.0 }
 0xc6b   : > { %1491 = vadd.xlane.f32.xlu1 %v1490_v38 }
 0xcde   : > { %v1492_v39 = vpop.xlane.xlu1 %1491 }
 0xcdf   : > { %v1493_v40 = vmul.f32 %v1492_v39, %v2001_v4  ;;  %v1682_v4 = vld [vmem:[%s2071_s17] ss:$0 sm:$0xff] }
 0xce1   : > { %v1494_v10 = vadd.f32 1e-05, %v1493_v40 }
 0xce3   : > { %1729 = vrsqrt.f32 %v1494_v10  ;;  %vm1501_vm6 = vweird.f32 %v1494_v10 }
 0xce9   : > { %v1730_v41 = vpop.eup %1729 }
 0xcea   : > { %v1496_v42 = vmul.f32 %v1730_v41, %v1494_v10  ;;  %vm1502_vm5 = vweird.f32 %v1730_v41 }
 0xceb   : > { %vm1503_vm7 = vmor %vm1501_vm6, %vm1502_vm5 }
 0xcec   : > { %v1497_v43 = vmul.f32 %v1730_v41, %v1496_v42 }
 0xcee   : > { %v1498_v44 = vmul.f32 0.5, %v1497_v43 }
 0xcf0   : > { %v1499_v45 = vsub.f32 1.5, %v1498_v44 }
 0xcf2   : > { %v1500_v5 = vmul.f32 %v1730_v41, %v1499_v45 }
 0xcf4   : > { %v1504_v29 = vsel %vm1503_vm7, %v1730_v41, %v1500_v5 }
 0xcf5   : > { %v1505_v47 = vmul.f32 %v1504_v29, %v1488_v36 }
 0xcf7   : > { %v1509_v48 = vmul.f32 %v1681_v46, %v1505_v47 }
 0xcf9   : > { %v1513_v50 = vadd.f32 %v1682_v4, %v1509_v48 }
 0xcfb   : > { %v1518_v51 = vmul.f32 %v1683_v49, %v1513_v50 }
 0xcfd   : > { %v1520_v52 = vsel %vm1519_vm8, %v1518_v51, 0.0 }
 0xcfe   : > { %1521 = vadd.xlane.f32.xlu1 %v1520_v52 }
 0xd71   : > { %v1522_v54 = vpop.xlane.xlu1 %1521 }
 0xd72   : > { %v1527_v55 = vadd.f32 %v1684_v53, %v1522_v54 }
 0xd74   : > { %1529 = vst.msk [vmem:[%s621_s0 - $0x7] sm:$0x80] %vm1528_vm9, %v1527_v55 }
 0xd75 PF: > { %s32_s23 = sadd.s32 1, %s1737_s23  }
 0xd76   : > { %p29_p4 = scmp.ge.s32.totalorder %s32_s23, 6  }
 0xd78   :  { %31 = sbr.rel (!%p29_p4) target bundleno = 6 (0x6), region = 130 }

</bundles_post_ra>
